<compile_context>
chip_gen: v7x
topology: tpu7x:2x2x1
jax: 0.10.0
libtpu: 0.0.40
codegen_flags: <defaults>
</compile_context>

<pallas_src>
import functools
import math

import jax
import jax.numpy as jnp
from jax.experimental import pallas as pl
from jax.experimental.pallas import tpu as pltpu

NEG_SLOPE = 0.01      # default negative slope of nn.LeakyReLU / F.leaky_relu
MASK_VALUE = 1e8      # diagonal-mask constant used by the PyTorch module
_HIGHEST = jax.lax.Precision.HIGHEST


def _leaky_relu(x):
    return jnp.where(x >= 0, x, NEG_SLOPE * x)


def _round_up(v, m):
    return ((v + m - 1) // m) * m


# ----------------------------------------------------------------------------
# Fused kernel: whole FeatureReweightingModule forward in one invocation.
# ----------------------------------------------------------------------------
def fused_forward_kernel(x_ref, sel_ref, par_ref, out_ref, *,
                         num_layers, mxu_dtype, sel_off, par_off):
    f32 = jnp.float32

    def take(ref, info):
        off, rows_padded, rows, cols = info        # static python ints (8/16-aligned offsets)
        v = ref[pl.ds(off, rows_padded), :]
        return v[:rows, :cols]

    # Selector constants: exact 0/+-1 values stored as bf16 (half the DMA bytes); casts hoisted.
    diff_m = take(sel_ref, sel_off["diff"]).astype(mxu_dtype)      # (B*N*N, B*N)
    row_sel = take(sel_ref, sel_off["row_sel"]).astype(f32)        # (B*N, B*N*N)
    col_sel = take(sel_ref, sel_off["col_sel"]).astype(f32)        # (B*N*N, B*N)
    neg_mask = take(par_ref, par_off["neg_mask"])                  # (B*N, B*N) f32 (0 / 1e8)

    def mm_mxu(a, b):   # big pair-MLP matmuls (M=128): bf16 operands in perf mode, f32 acc
        return jnp.dot(a.astype(mxu_dtype), b.astype(mxu_dtype),
                       preferred_element_type=f32)

    def mm_f32(a, b):   # tiny scatter / graph matmuls: keep f32 (accuracy is free here)
        return jnp.dot(a, b, preferred_element_type=f32)

    xcat = x_ref[...].astype(f32)          # (B*N, C); grows by features//2 lanes per level
    outputs = []

    for lvl in range(num_layers + 1):
        w1 = take(par_ref, par_off[f"w1_{lvl}"]); b1 = take(par_ref, par_off[f"b1_{lvl}"])
        w2 = take(par_ref, par_off[f"w2_{lvl}"]); b2 = take(par_ref, par_off[f"b2_{lvl}"])
        w3 = take(par_ref, par_off[f"w3_{lvl}"]); b3 = take(par_ref, par_off[f"b3_{lvl}"])
        w4 = take(par_ref, par_off[f"w4_{lvl}"]); b4 = take(par_ref, par_off[f"b4_{lvl}"])
        w5 = take(par_ref, par_off[f"w5_{lvl}"]); b5 = take(par_ref, par_off[f"b5_{lvl}"])
        wg = take(par_ref, par_off[f"wg_{lvl}"]); bg = take(par_ref, par_off[f"bg_{lvl}"])

        # ---- AdjacencyMatrixPrediction ----
        # |x_i - x_j| for every (b, i, j) pair as ONE matmul on the concatenated channels.
        pair_abs = jnp.abs(mm_mxu(diff_m, xcat))                   # (B*N*N, C)
        h = _leaky_relu(mm_mxu(pair_abs, w1) + b1)
        # TODO(synk): nn.Dropout(0.3) after this layer is train-time only; identity at inference.
        h = _leaky_relu(mm_mxu(h, w2) + b2)
        h = _leaky_relu(mm_mxu(h, w3) + b3)
        h = _leaky_relu(mm_mxu(h, w4) + b4)
        # Width-1 last 1x1 conv: VPU multiply + XLU lane reduce instead of a 1-lane MXU push.
        scores = jnp.sum(h * w5, axis=-1, keepdims=True) + b5      # (B*N*N, 1) f32
        # Scatter pair scores into a block-diagonal (B*N, B*N) logit matrix (f32), mask the
        # diagonal + cross-batch lanes with -1e8 (underflow to exactly 0 after exp), then do
        # an exact row softmax over j (matches PyTorch transpose/view/F.softmax sequence).
        logits = mm_f32(row_sel, scores * col_sel) - neg_mask
        m = jnp.max(logits, axis=-1, keepdims=True)
        p = jnp.exp(logits - m)
        a_bd = p / jnp.sum(p, axis=-1, keepdims=True)              # rows sum to 1 (exact divide)
        outputs.append(a_bd)

        # ---- GraphModule: gmul with the J2 operator [I, A] fused with the Linear ----
        ax = mm_f32(a_bd, xcat)                                    # (B*N, C)
        x_new = mm_f32(jnp.concatenate([xcat, ax], axis=-1), wg) + bg
        if lvl < num_layers:
            xcat = jnp.concatenate([xcat, _leaky_relu(x_new)], axis=-1)   # torch.cat([x, x_new], 2)
        else:
            outputs.append(x_new)                                  # (B*N, out_dim)

    # Single lane-dense output slab: [A_0 | A_1 | ... | x_out | zero pad] -> one unmasked
    # full-width store and a single writeback DMA.
    slab = jnp.concatenate(outputs, axis=-1)
    pad = out_ref.shape[1] - slab.shape[1]
    if pad:
        slab = jnp.concatenate([slab, jnp.zeros((slab.shape[0], pad), f32)], axis=-1)
    out_ref[...] = slab.astype(out_ref.dtype)


# ----------------------------------------------------------------------------
# Host-side constants (depend only on B, N; constant-folded under jit).
# ----------------------------------------------------------------------------
def _pair_constants(batch, n):
    bn, bnn = batch * n, batch * n * n
    r = jnp.arange(bnn)
    b_idx, i_idx, j_idx = r // (n * n), (r // n) % n, r % n
    cols = jnp.arange(bn)
    one_hot_i = (cols[None, :] == (b_idx * n + i_idx)[:, None])
    one_hot_j = (cols[None, :] == (b_idx * n + j_idx)[:, None])
    # Exact 0/+-1 entries -> store as bf16 to halve the constant DMA bytes.
    diff_mat = one_hot_i.astype(jnp.bfloat16) - one_hot_j.astype(jnp.bfloat16)  # (bnn, bn)
    col_sel = one_hot_j.astype(jnp.bfloat16)                                    # (bnn, bn)
    row_sel = ((r[None, :] // n) == cols[:, None]).astype(jnp.bfloat16)         # (bn, bnn)
    qb = cols // n
    same_batch = qb[:, None] == qb[None, :]
    diag = cols[:, None] == cols[None, :]
    neg_mask = jnp.where(same_batch & ~diag, 0.0, MASK_VALUE).astype(jnp.float32)
    return diff_mat, row_sel, col_sel, neg_mask


# ----------------------------------------------------------------------------
# Slab packing: many tiny arrays -> one padded 2-D slab + static offsets.
# ----------------------------------------------------------------------------
def _pack_slab(items, row_align, dtype):
    lane = max(a.shape[1] for _, a in items)
    offsets, chunks, off = {}, [], 0
    for name, a in items:
        r, c = a.shape
        rp = _round_up(r, row_align)
        offsets[name] = (off, rp, r, c)
        chunks.append(jnp.pad(a.astype(dtype), ((0, rp - r), (0, lane - c))))
        off += rp
    return jnp.concatenate(chunks, axis=0), offsets


def _full_spec(shape):
    nd = len(shape)
    return pl.BlockSpec(shape, lambda i, nd=nd: (0,) * nd)


# ----------------------------------------------------------------------------
# pallas_call wrapper
# ----------------------------------------------------------------------------
def feature_reweighting_forward(params, x, *, precise=False):
    """x: (B, N, C) support features -> (out (B,N,out_dim), [classifier (B,N,N,1), ...])."""
    batch, n, c0 = x.shape
    bn = batch * n
    num_layers = len([k for k in params if k.startswith("adj_") and k != "adj_last"])
    out_dim = params["graph_last"][0].shape[1]

    diff_mat, row_sel, col_sel, neg_mask = _pair_constants(batch, n)
    x_flat = x.reshape(bn, c0)

    # One bf16 slab for the 0/+-1 selector constants ...
    sel_slab, sel_off = _pack_slab(
        [("diff", diff_mat), ("row_sel", row_sel), ("col_sel", col_sel)],
        row_align=16, dtype=jnp.bfloat16)

    # ... and one f32 slab for every weight/bias of every level + the softmax mask,
    # so the kernel sees 3 inputs / 3 prologue DMAs instead of ~30.
    items = [("neg_mask", neg_mask)]
    for lvl in range(num_layers + 1):
        adj = params[f"adj_{lvl}"] if lvl < num_layers else params["adj_last"]
        wg, bg = params[f"graph_{lvl}"] if lvl < num_layers else params["graph_last"]
        (w1, b1), (w2, b2), (w3, b3), (w4, b4), (w5, b5) = adj
        items += [
            (f"w1_{lvl}", w1), (f"w2_{lvl}", w2), (f"w3_{lvl}", w3),
            (f"w4_{lvl}", w4), (f"w5_{lvl}", w5.reshape(1, -1)), (f"wg_{lvl}", wg),
            (f"b1_{lvl}", b1), (f"b2_{lvl}", b2), (f"b3_{lvl}", b3),
            (f"b4_{lvl}", b4), (f"b5_{lvl}", b5), (f"bg_{lvl}", bg)]
    par_slab, par_off = _pack_slab(items, row_align=8, dtype=jnp.float32)

    out_lanes = _round_up((num_layers + 1) * bn + out_dim, 128)

    kernel = functools.partial(
        fused_forward_kernel,
        num_layers=num_layers,
        mxu_dtype=jnp.float32 if precise else jnp.bfloat16,
        sel_off=sel_off, par_off=par_off)

    slab = pl.pallas_call(
        kernel,
        out_shape=jax.ShapeDtypeStruct((bn, out_lanes), jnp.float32),
        grid=(1,),                                   # whole problem = one 128-row MXU slab
        in_specs=[_full_spec(x_flat.shape), _full_spec(sel_slab.shape),
                  _full_spec(par_slab.shape)],
        out_specs=_full_spec((bn, out_lanes)),
        compiler_params=pltpu.CompilerParams(
            dimension_semantics=("arbitrary",),
            # Scalability guard: selector matrices grow as O(B^2 N^3); keep an explicit VMEM
            # budget (fits all generations; raise / switch strategy if B, N grow).
            vmem_limit_bytes=32 * 1024 * 1024),
    )(x_flat, sel_slab, par_slab)

    # Split the merged output slab back into per-level classifiers and the final features.
    classifiers = []
    for lvl in range(num_layers + 1):
        a_bd = slab[:, lvl * bn:(lvl + 1) * bn]
        a = jnp.stack([a_bd[b * n:(b + 1) * n, b * n:(b + 1) * n] for b in range(batch)],
                      axis=0)
        classifiers.append(a[..., None])             # (B, N, N, 1) like the PyTorch classifier
    out = slab[:, (num_layers + 1) * bn:(num_layers + 1) * bn + out_dim]
    return out.reshape(batch, n, out_dim), classifiers


# ----------------------------------------------------------------------------
# Deterministic parameter init (shapes from the module's __init__)
# ----------------------------------------------------------------------------
def _dense_init(key, cin, cout):
    kw, kb = jax.random.split(key)
    bound = 1.0 / math.sqrt(cin)
    w = jax.random.uniform(kw, (cin, cout), jnp.float32, -bound, bound)
    b = jax.random.uniform(kb, (1, cout), jnp.float32, -bound, bound)
    return w, b


def init_adjacency_params(key, cin, features):
    # Conv2d(k=1) channel chain with ratio=[2,2,1,1]: cin -> 2f -> 2f -> 2f -> f -> 1
    dims = [cin, 2 * features, 2 * features, 2 * features, features, 1]
    keys = jax.random.split(key, 5)
    return [_dense_init(keys[i], dims[i], dims[i + 1]) for i in range(5)]


def init_feature_reweighting_params(key, input_features, output_dim=4,
                                    num_layers=1, features=96):
    half = features // 2
    params = {}
    for i in range(num_layers):
        key, ka, kg = jax.random.split(key, 3)
        cin = input_features + half * i
        params[f"adj_{i}"] = init_adjacency_params(ka, cin, features)
        params[f"graph_{i}"] = _dense_init(kg, 2 * cin, half)          # J = 2
    key, ka, kg = jax.random.split(key, 3)
    cin = input_features + half * num_layers
    params["adj_last"] = init_adjacency_params(ka, cin, features)
    params["graph_last"] = _dense_init(kg, 2 * cin, output_dim)
    return params


# ----------------------------------------------------------------------------
# Pure-JAX f32 reference (mirrors the PyTorch module, inference mode)
# ----------------------------------------------------------------------------
def reference_forward(params, x):
    batch, n, _ = x.shape
    num_layers = len([k for k in params if k.startswith("adj_") and k != "adj_last"])
    eye = jnp.eye(n, dtype=jnp.float32)

    def adjacency(xc, layer_params):
        diff = jnp.abs(xc[:, :, None, :] - xc[:, None, :, :])         # (B, N, N, C)
        h = diff.reshape(batch * n * n, -1)
        for k, (w, b) in enumerate(layer_params):
            h = jnp.dot(h, w, precision=_HIGHEST) + b
            if k < len(layer_params) - 1:
                h = _leaky_relu(h)
        logits = h.reshape(batch, n, n) - eye[None] * MASK_VALUE
        return jax.nn.softmax(logits, axis=-1)

    def graph(a, xc, w, b):
        ax = jnp.einsum("bij,bjc->bic", a, xc, precision=_HIGHEST)
        return jnp.dot(jnp.concatenate([xc, ax], axis=-1), w, precision=_HIGHEST) + b

    classifiers = []
    for i in range(num_layers):
        a = adjacency(x, params[f"adj_{i}"])
        classifiers.append(a[..., None])
        w, b = params[f"graph_{i}"]
        x = jnp.concatenate([x, _leaky_relu(graph(a, x, w, b))], axis=-1)
    a = adjacency(x, params["adj_last"])
    classifiers.append(a[..., None])
    w, b = params["graph_last"]
    return graph(a, x, w, b), classifiers


if __name__ == "__main__":
    B, N = 2, 8                             # batch, number of support features (B*N*N = 128)
    input_features, features, output_dim, num_layers = 16, 32, 4, 1

    key = jax.random.PRNGKey(0)
    kp, kx = jax.random.split(key)
    params = init_feature_reweighting_params(
        kp, input_features, output_dim=output_dim,
        num_layers=num_layers, features=features)
    x = jax.random.normal(kx, (B, N, input_features), jnp.float32)

    fwd = jax.jit(feature_reweighting_forward, static_argnames=("precise",))
    out_ref, cls_ref = reference_forward(params, x)

    # f32 mode (f32 MXU operands everywhere): tight agreement with the reference.
    out_f32, cls_f32 = fwd(params, x, precise=True)
    out_f32 = jax.block_until_ready(out_f32)
    assert out_f32.shape == (B, N, output_dim)
    assert len(cls_f32) == num_layers + 1
    assert all(c.shape == (B, N, N, 1) for c in cls_f32)
    assert bool(jnp.allclose(out_f32, out_ref, rtol=2e-2, atol=2e-2))
    assert all(bool(jnp.allclose(a, r, atol=2e-2)) for a, r in zip(cls_f32, cls_ref))
    rowsum_f32 = jnp.sum(cls_f32[0][..., 0], axis=-1)
    assert bool(jnp.allclose(rowsum_f32, 1.0, atol=1e-4))

    # Default perf mode (bf16 pair-MLP matmuls, f32 scatter/graph, exact softmax divide).
    out, classifiers = fwd(params, x)
    out = jax.block_until_ready(out)
    classifiers = jax.block_until_ready(classifiers)
    assert out.shape == (B, N, output_dim)
    assert bool(jnp.allclose(out, out_ref, rtol=8e-2, atol=8e-2))
    assert all(bool(jnp.allclose(a, r, atol=6e-2)) for a, r in zip(classifiers, cls_ref))
    rowsum = jnp.sum(classifiers[0][..., 0], axis=-1)
    assert bool(jnp.allclose(rowsum, 1.0, atol=1e-4))
    assert bool(jnp.all(jnp.isfinite(out)))
    print("KERNEL_OK")
</pallas_src>

<mosaic_0001>
module attributes {stable_mosaic.version = 11 : i64} {
  func.func @fused_forward_kernel(%arg0: i32, %arg1: memref<16x16xf32, #tpu.memory_space<vmem>>, %arg2: memref<272x128xbf16, #tpu.memory_space<vmem>>, %arg3: memref<656x64xf32, #tpu.memory_space<vmem>>, %arg4: memref<16x128xf32, #tpu.memory_space<vmem>>) attributes {dimension_semantics = [#tpu.dimension_semantics<arbitrary>], iteration_bounds = array<i64: 1>, scalar_prefetch = 0 : i64, scratch_operands = 0 : i64, tpu.core_type = #tpu.core_type<tc>, window_params = [{pipeline_mode = #tpu.pipeline_mode<synchronous>, transform_indices = @transform_0, window_bounds = array<i64: 16, 16>}, {pipeline_mode = #tpu.pipeline_mode<synchronous>, transform_indices = @transform_1, window_bounds = array<i64: 272, 128>}, {pipeline_mode = #tpu.pipeline_mode<synchronous>, transform_indices = @transform_2, window_bounds = array<i64: 656, 64>}, {pipeline_mode = #tpu.pipeline_mode<synchronous>, transform_indices = @transform_3, window_bounds = array<i64: 16, 128>}]} {
    %c0 = arith.constant 0 : index
    %c0_0 = arith.constant 0 : index
    %0 = vector.load %arg2[%c0, %c0_0] : memref<272x128xbf16, #tpu.memory_space<vmem>>, vector<128x128xbf16>
    %1 = vector.extract_strided_slice %0 {offsets = [0, 0], sizes = [128, 16], strides = [1, 1]} : vector<128x128xbf16> to vector<128x16xbf16>
    %2 = arith.extf %1 : vector<128x16xbf16> to vector<128x16xf32>
    %c128 = arith.constant 128 : index
    %c0_1 = arith.constant 0 : index
    %3 = vector.load %arg2[%c128, %c0_1] : memref<272x128xbf16, #tpu.memory_space<vmem>>, vector<16x128xbf16>
    %4 = arith.extf %3 : vector<16x128xbf16> to vector<16x128xf32>
    %c144 = arith.constant 144 : index
    %c0_2 = arith.constant 0 : index
    %5 = vector.load %arg2[%c144, %c0_2] : memref<272x128xbf16, #tpu.memory_space<vmem>>, vector<128x128xbf16>
    %6 = vector.extract_strided_slice %5 {offsets = [0, 0], sizes = [128, 16], strides = [1, 1]} : vector<128x128xbf16> to vector<128x16xbf16>
    %7 = arith.extf %6 : vector<128x16xbf16> to vector<128x16xf32>
    %c0_3 = arith.constant 0 : index
    %c0_4 = arith.constant 0 : index
    %8 = vector.load %arg3[%c0_3, %c0_4] : memref<656x64xf32, #tpu.memory_space<vmem>>, vector<16x64xf32>
    %9 = vector.extract_strided_slice %8 {offsets = [0, 0], sizes = [16, 16], strides = [1, 1]} : vector<16x64xf32> to vector<16x16xf32>
    %c0_5 = arith.constant 0 : index
    %c0_6 = arith.constant 0 : index
    %10 = vector.load %arg1[%c0_5, %c0_6] : memref<16x16xf32, #tpu.memory_space<vmem>>, vector<16x16xf32>
    %c16 = arith.constant 16 : index
    %c0_7 = arith.constant 0 : index
    %11 = vector.load %arg3[%c16, %c0_7] : memref<656x64xf32, #tpu.memory_space<vmem>>, vector<16x64xf32>
    %c264 = arith.constant 264 : index
    %c0_8 = arith.constant 0 : index
    %12 = vector.load %arg3[%c264, %c0_8] : memref<656x64xf32, #tpu.memory_space<vmem>>, vector<8x64xf32>
    %13 = vector.extract_strided_slice %12 {offsets = [0, 0], sizes = [1, 64], strides = [1, 1]} : vector<8x64xf32> to vector<1x64xf32>
    %c32 = arith.constant 32 : index
    %c0_9 = arith.constant 0 : index
    %14 = vector.load %arg3[%c32, %c0_9] : memref<656x64xf32, #tpu.memory_space<vmem>>, vector<64x64xf32>
    %c272 = arith.constant 272 : index
    %c0_10 = arith.constant 0 : index
    %15 = vector.load %arg3[%c272, %c0_10] : memref<656x64xf32, #tpu.memory_space<vmem>>, vector<8x64xf32>
    %16 = vector.extract_strided_slice %15 {offsets = [0, 0], sizes = [1, 64], strides = [1, 1]} : vector<8x64xf32> to vector<1x64xf32>
    %c96 = arith.constant 96 : index
    %c0_11 = arith.constant 0 : index
    %17 = vector.load %arg3[%c96, %c0_11] : memref<656x64xf32, #tpu.memory_space<vmem>>, vector<64x64xf32>
    %c280 = arith.constant 280 : index
    %c0_12 = arith.constant 0 : index
    %18 = vector.load %arg3[%c280, %c0_12] : memref<656x64xf32, #tpu.memory_space<vmem>>, vector<8x64xf32>
    %19 = vector.extract_strided_slice %18 {offsets = [0, 0], sizes = [1, 64], strides = [1, 1]} : vector<8x64xf32> to vector<1x64xf32>
    %c160 = arith.constant 160 : index
    %c0_13 = arith.constant 0 : index
    %20 = vector.load %arg3[%c160, %c0_13] : memref<656x64xf32, #tpu.memory_space<vmem>>, vector<64x64xf32>
    %21 = vector.extract_strided_slice %20 {offsets = [0, 0], sizes = [64, 32], strides = [1, 1]} : vector<64x64xf32> to vector<64x32xf32>
    %c288 = arith.constant 288 : index
    %c0_14 = arith.constant 0 : index
    %22 = vector.load %arg3[%c288, %c0_14] : memref<656x64xf32, #tpu.memory_space<vmem>>, vector<8x64xf32>
    %23 = vector.extract_strided_slice %22 {offsets = [0, 0], sizes = [1, 32], strides = [1, 1]} : vector<8x64xf32> to vector<1x32xf32>
    %c224 = arith.constant 224 : index
    %c0_15 = arith.constant 0 : index
    %24 = vector.load %arg3[%c224, %c0_15] : memref<656x64xf32, #tpu.memory_space<vmem>>, vector<8x64xf32>
    %25 = vector.extract_strided_slice %24 {offsets = [0, 0], sizes = [1, 32], strides = [1, 1]} : vector<8x64xf32> to vector<1x32xf32>
    %c296 = arith.constant 296 : index
    %c0_16 = arith.constant 0 : index
    %26 = vector.load %arg3[%c296, %c0_16] : memref<656x64xf32, #tpu.memory_space<vmem>>, vector<8x64xf32>
    %27 = vector.extract_strided_slice %26 {offsets = [0, 0], sizes = [1, 1], strides = [1, 1]} : vector<8x64xf32> to vector<1x1xf32>
    %c232 = arith.constant 232 : index
    %c0_17 = arith.constant 0 : index
    %28 = vector.load %arg3[%c232, %c0_17] : memref<656x64xf32, #tpu.memory_space<vmem>>, vector<32x64xf32>
    %29 = vector.extract_strided_slice %28 {offsets = [0, 0], sizes = [32, 16], strides = [1, 1]} : vector<32x64xf32> to vector<32x16xf32>
    %c304 = arith.constant 304 : index
    %c0_18 = arith.constant 0 : index
    %30 = vector.load %arg3[%c304, %c0_18] : memref<656x64xf32, #tpu.memory_space<vmem>>, vector<8x64xf32>
    %31 = vector.extract_strided_slice %30 {offsets = [0, 0], sizes = [1, 16], strides = [1, 1]} : vector<8x64xf32> to vector<1x16xf32>
    %cst = arith.constant dense<0.000000e+00> : vector<128x16xf32>
    %32 = tpu.matmul %2, %10, %cst {dimension_numbers = #tpu.dot_dimension_numbers<[1], [0], [0], [1], [0, 0, 1, 1], [], []>} : vector<128x16xf32>, vector<16x16xf32>, vector<128x16xf32> -> vector<128x16xf32>
    %33 = math.absf %32 : vector<128x16xf32>
    %cst_19 = arith.constant dense<0.000000e+00> : vector<128x64xf32>
    %34 = tpu.matmul %33, %11, %cst_19 {dimension_numbers = #tpu.dot_dimension_numbers<[1], [0], [0], [1], [0, 0, 1, 1], [], []>} : vector<128x16xf32>, vector<16x64xf32>, vector<128x64xf32> -> vector<128x64xf32>
    %35 = vector.broadcast %13 : vector<1x64xf32> to vector<128x64xf32>
    %36 = arith.addf %34, %35 : vector<128x64xf32>
    %cst_20 = arith.constant 0.000000e+00 : f32
    %37 = vector.broadcast %cst_20 : f32 to vector<128x64xf32>
    %38 = arith.cmpf oge, %36, %37 : vector<128x64xf32>
    %cst_21 = arith.constant 0.00999999977 : f32
    %39 = vector.broadcast %cst_21 : f32 to vector<128x64xf32>
    %40 = arith.mulf %39, %36 : vector<128x64xf32>
    %41 = arith.select %38, %36, %40 : vector<128x64xi1>, vector<128x64xf32>
    %cst_22 = arith.constant dense<0.000000e+00> : vector<128x64xf32>
    %42 = tpu.matmul %41, %14, %cst_22 {dimension_numbers = #tpu.dot_dimension_numbers<[1], [0], [0], [1], [0, 0, 1, 1], [], []>} : vector<128x64xf32>, vector<64x64xf32>, vector<128x64xf32> -> vector<128x64xf32>
    %43 = vector.broadcast %16 : vector<1x64xf32> to vector<128x64xf32>
    %44 = arith.addf %42, %43 : vector<128x64xf32>
    %cst_23 = arith.constant 0.000000e+00 : f32
    %45 = vector.broadcast %cst_23 : f32 to vector<128x64xf32>
    %46 = arith.cmpf oge, %44, %45 : vector<128x64xf32>
    %cst_24 = arith.constant 0.00999999977 : f32
    %47 = vector.broadcast %cst_24 : f32 to vector<128x64xf32>
    %48 = arith.mulf %47, %44 : vector<128x64xf32>
    %49 = arith.select %46, %44, %48 : vector<128x64xi1>, vector<128x64xf32>
    %cst_25 = arith.constant dense<0.000000e+00> : vector<128x64xf32>
    %50 = tpu.matmul %49, %17, %cst_25 {dimension_numbers = #tpu.dot_dimension_numbers<[1], [0], [0], [1], [0, 0, 1, 1], [], []>} : vector<128x64xf32>, vector<64x64xf32>, vector<128x64xf32> -> vector<128x64xf32>
    %51 = vector.broadcast %19 : vector<1x64xf32> to vector<128x64xf32>
    %52 = arith.addf %50, %51 : vector<128x64xf32>
    %cst_26 = arith.constant 0.000000e+00 : f32
    %53 = vector.broadcast %cst_26 : f32 to vector<128x64xf32>
    %54 = arith.cmpf oge, %52, %53 : vector<128x64xf32>
    %cst_27 = arith.constant 0.00999999977 : f32
    %55 = vector.broadcast %cst_27 : f32 to vector<128x64xf32>
    %56 = arith.mulf %55, %52 : vector<128x64xf32>
    %57 = arith.select %54, %52, %56 : vector<128x64xi1>, vector<128x64xf32>
    %cst_28 = arith.constant dense<0.000000e+00> : vector<128x32xf32>
    %58 = tpu.matmul %57, %21, %cst_28 {dimension_numbers = #tpu.dot_dimension_numbers<[1], [0], [0], [1], [0, 0, 1, 1], [], []>} : vector<128x64xf32>, vector<64x32xf32>, vector<128x32xf32> -> vector<128x32xf32>
    %59 = vector.broadcast %23 : vector<1x32xf32> to vector<128x32xf32>
    %60 = arith.addf %58, %59 : vector<128x32xf32>
    %cst_29 = arith.constant 0.000000e+00 : f32
    %61 = vector.broadcast %cst_29 : f32 to vector<128x32xf32>
    %62 = arith.cmpf oge, %60, %61 : vector<128x32xf32>
    %cst_30 = arith.constant 0.00999999977 : f32
    %63 = vector.broadcast %cst_30 : f32 to vector<128x32xf32>
    %64 = arith.mulf %63, %60 : vector<128x32xf32>
    %65 = arith.select %62, %60, %64 : vector<128x32xi1>, vector<128x32xf32>
    %66 = vector.broadcast %25 : vector<1x32xf32> to vector<128x32xf32>
    %67 = arith.mulf %65, %66 : vector<128x32xf32>
    %cst_31 = arith.constant dense<0.000000e+00> : vector<128xf32>
    %68 = vector.multi_reduction <add>, %67, %cst_31 [1] : vector<128x32xf32> to vector<128xf32>
    %69 = vector.shape_cast %68 : vector<128xf32> to vector<128x1xf32>
    %70 = vector.broadcast %27 : vector<1x1xf32> to vector<128x1xf32>
    %71 = arith.addf %69, %70 : vector<128x1xf32>
    %72 = vector.broadcast %71 : vector<128x1xf32> to vector<128x16xf32>
    %73 = arith.mulf %72, %7 : vector<128x16xf32>
    %cst_32 = arith.constant dense<0.000000e+00> : vector<16x16xf32>
    %74 = tpu.matmul %4, %73, %cst_32 {dimension_numbers = #tpu.dot_dimension_numbers<[1], [0], [0], [1], [0, 0, 1, 1], [], []>} : vector<16x128xf32>, vector<128x16xf32>, vector<16x16xf32> -> vector<16x16xf32>
    %75 = arith.subf %74, %9 : vector<16x16xf32>
    %cst_33 = arith.constant dense<0xFF800000> : vector<16xf32>
    %76 = vector.multi_reduction <maximumf>, %75, %cst_33 [1] : vector<16x16xf32> to vector<16xf32>
    %77 = vector.shape_cast %76 : vector<16xf32> to vector<16x1xf32>
    %78 = vector.broadcast %77 : vector<16x1xf32> to vector<16x16xf32>
    %79 = arith.subf %75, %78 : vector<16x16xf32>
    %80 = math.exp %79 : vector<16x16xf32>
    %cst_34 = arith.constant dense<0.000000e+00> : vector<16xf32>
    %81 = vector.multi_reduction <add>, %80, %cst_34 [1] : vector<16x16xf32> to vector<16xf32>
    %82 = vector.shape_cast %81 : vector<16xf32> to vector<16x1xf32>
    %83 = vector.broadcast %82 : vector<16x1xf32> to vector<16x16xf32>
    %84 = arith.divf %80, %83 : vector<16x16xf32>
    %cst_35 = arith.constant dense<0.000000e+00> : vector<16x16xf32>
    %85 = tpu.matmul %84, %10, %cst_35 {dimension_numbers = #tpu.dot_dimension_numbers<[1], [0], [0], [1], [0, 0, 1, 1], [], []>} : vector<16x16xf32>, vector<16x16xf32>, vector<16x16xf32> -> vector<16x16xf32>
    %86 = tpu.concatenate %10, %85 in 1 : vector<16x16xf32>, vector<16x16xf32> -> vector<16x32xf32>
    %cst_36 = arith.constant dense<0.000000e+00> : vector<16x16xf32>
    %87 = tpu.matmul %86, %29, %cst_36 {dimension_numbers = #tpu.dot_dimension_numbers<[1], [0], [0], [1], [0, 0, 1, 1], [], []>} : vector<16x32xf32>, vector<32x16xf32>, vector<16x16xf32> -> vector<16x16xf32>
    %88 = vector.broadcast %31 : vector<1x16xf32> to vector<16x16xf32>
    %89 = arith.addf %87, %88 : vector<16x16xf32>
    %cst_37 = arith.constant 0.000000e+00 : f32
    %90 = vector.broadcast %cst_37 : f32 to vector<16x16xf32>
    %91 = arith.cmpf oge, %89, %90 : vector<16x16xf32>
    %cst_38 = arith.constant 0.00999999977 : f32
    %92 = vector.broadcast %cst_38 : f32 to vector<16x16xf32>
    %93 = arith.mulf %92, %89 : vector<16x16xf32>
    %94 = arith.select %91, %89, %93 : vector<16x16xi1>, vector<16x16xf32>
    %95 = tpu.concatenate %10, %94 in 1 : vector<16x16xf32>, vector<16x16xf32> -> vector<16x32xf32>
    %c312 = arith.constant 312 : index
    %c0_39 = arith.constant 0 : index
    %96 = vector.load %arg3[%c312, %c0_39] : memref<656x64xf32, #tpu.memory_space<vmem>>, vector<32x64xf32>
    %c608 = arith.constant 608 : index
    %c0_40 = arith.constant 0 : index
    %97 = vector.load %arg3[%c608, %c0_40] : memref<656x64xf32, #tpu.memory_space<vmem>>, vector<8x64xf32>
    %98 = vector.extract_strided_slice %97 {offsets = [0, 0], sizes = [1, 64], strides = [1, 1]} : vector<8x64xf32> to vector<1x64xf32>
    %c344 = arith.constant 344 : index
    %c0_41 = arith.constant 0 : index
    %99 = vector.load %arg3[%c344, %c0_41] : memref<656x64xf32, #tpu.memory_space<vmem>>, vector<64x64xf32>
    %c616 = arith.constant 616 : index
    %c0_42 = arith.constant 0 : index
    %100 = vector.load %arg3[%c616, %c0_42] : memref<656x64xf32, #tpu.memory_space<vmem>>, vector<8x64xf32>
    %101 = vector.extract_strided_slice %100 {offsets = [0, 0], sizes = [1, 64], strides = [1, 1]} : vector<8x64xf32> to vector<1x64xf32>
    %c408 = arith.constant 408 : index
    %c0_43 = arith.constant 0 : index
    %102 = vector.load %arg3[%c408, %c0_43] : memref<656x64xf32, #tpu.memory_space<vmem>>, vector<64x64xf32>
    %c624 = arith.constant 624 : index
    %c0_44 = arith.constant 0 : index
    %103 = vector.load %arg3[%c624, %c0_44] : memref<656x64xf32, #tpu.memory_space<vmem>>, vector<8x64xf32>
    %104 = vector.extract_strided_slice %103 {offsets = [0, 0], sizes = [1, 64], strides = [1, 1]} : vector<8x64xf32> to vector<1x64xf32>
    %c472 = arith.constant 472 : index
    %c0_45 = arith.constant 0 : index
    %105 = vector.load %arg3[%c472, %c0_45] : memref<656x64xf32, #tpu.memory_space<vmem>>, vector<64x64xf32>
    %106 = vector.extract_strided_slice %105 {offsets = [0, 0], sizes = [64, 32], strides = [1, 1]} : vector<64x64xf32> to vector<64x32xf32>
    %c632 = arith.constant 632 : index
    %c0_46 = arith.constant 0 : index
    %107 = vector.load %arg3[%c632, %c0_46] : memref<656x64xf32, #tpu.memory_space<vmem>>, vector<8x64xf32>
    %108 = vector.extract_strided_slice %107 {offsets = [0, 0], sizes = [1, 32], strides = [1, 1]} : vector<8x64xf32> to vector<1x32xf32>
    %c536 = arith.constant 536 : index
    %c0_47 = arith.constant 0 : index
    %109 = vector.load %arg3[%c536, %c0_47] : memref<656x64xf32, #tpu.memory_space<vmem>>, vector<8x64xf32>
    %110 = vector.extract_strided_slice %109 {offsets = [0, 0], sizes = [1, 32], strides = [1, 1]} : vector<8x64xf32> to vector<1x32xf32>
    %c640 = arith.constant 640 : index
    %c0_48 = arith.constant 0 : index
    %111 = vector.load %arg3[%c640, %c0_48] : memref<656x64xf32, #tpu.memory_space<vmem>>, vector<8x64xf32>
    %112 = vector.extract_strided_slice %111 {offsets = [0, 0], sizes = [1, 1], strides = [1, 1]} : vector<8x64xf32> to vector<1x1xf32>
    %c544 = arith.constant 544 : index
    %c0_49 = arith.constant 0 : index
    %113 = vector.load %arg3[%c544, %c0_49] : memref<656x64xf32, #tpu.memory_space<vmem>>, vector<64x64xf32>
    %114 = vector.extract_strided_slice %113 {offsets = [0, 0], sizes = [64, 4], strides = [1, 1]} : vector<64x64xf32> to vector<64x4xf32>
    %c648 = arith.constant 648 : index
    %c0_50 = arith.constant 0 : index
    %115 = vector.load %arg3[%c648, %c0_50] : memref<656x64xf32, #tpu.memory_space<vmem>>, vector<8x64xf32>
    %116 = vector.extract_strided_slice %115 {offsets = [0, 0], sizes = [1, 4], strides = [1, 1]} : vector<8x64xf32> to vector<1x4xf32>
    %cst_51 = arith.constant dense<0.000000e+00> : vector<128x32xf32>
    %117 = tpu.matmul %2, %95, %cst_51 {dimension_numbers = #tpu.dot_dimension_numbers<[1], [0], [0], [1], [0, 0, 1, 1], [], []>} : vector<128x16xf32>, vector<16x32xf32>, vector<128x32xf32> -> vector<128x32xf32>
    %118 = math.absf %117 : vector<128x32xf32>
    %cst_52 = arith.constant dense<0.000000e+00> : vector<128x64xf32>
    %119 = tpu.matmul %118, %96, %cst_52 {dimension_numbers = #tpu.dot_dimension_numbers<[1], [0], [0], [1], [0, 0, 1, 1], [], []>} : vector<128x32xf32>, vector<32x64xf32>, vector<128x64xf32> -> vector<128x64xf32>
    %120 = vector.broadcast %98 : vector<1x64xf32> to vector<128x64xf32>
    %121 = arith.addf %119, %120 : vector<128x64xf32>
    %cst_53 = arith.constant 0.000000e+00 : f32
    %122 = vector.broadcast %cst_53 : f32 to vector<128x64xf32>
    %123 = arith.cmpf oge, %121, %122 : vector<128x64xf32>
    %cst_54 = arith.constant 0.00999999977 : f32
    %124 = vector.broadcast %cst_54 : f32 to vector<128x64xf32>
    %125 = arith.mulf %124, %121 : vector<128x64xf32>
    %126 = arith.select %123, %121, %125 : vector<128x64xi1>, vector<128x64xf32>
    %cst_55 = arith.constant dense<0.000000e+00> : vector<128x64xf32>
    %127 = tpu.matmul %126, %99, %cst_55 {dimension_numbers = #tpu.dot_dimension_numbers<[1], [0], [0], [1], [0, 0, 1, 1], [], []>} : vector<128x64xf32>, vector<64x64xf32>, vector<128x64xf32> -> vector<128x64xf32>
    %128 = vector.broadcast %101 : vector<1x64xf32> to vector<128x64xf32>
    %129 = arith.addf %127, %128 : vector<128x64xf32>
    %cst_56 = arith.constant 0.000000e+00 : f32
    %130 = vector.broadcast %cst_56 : f32 to vector<128x64xf32>
    %131 = arith.cmpf oge, %129, %130 : vector<128x64xf32>
    %cst_57 = arith.constant 0.00999999977 : f32
    %132 = vector.broadcast %cst_57 : f32 to vector<128x64xf32>
    %133 = arith.mulf %132, %129 : vector<128x64xf32>
    %134 = arith.select %131, %129, %133 : vector<128x64xi1>, vector<128x64xf32>
    %cst_58 = arith.constant dense<0.000000e+00> : vector<128x64xf32>
    %135 = tpu.matmul %134, %102, %cst_58 {dimension_numbers = #tpu.dot_dimension_numbers<[1], [0], [0], [1], [0, 0, 1, 1], [], []>} : vector<128x64xf32>, vector<64x64xf32>, vector<128x64xf32> -> vector<128x64xf32>
    %136 = vector.broadcast %104 : vector<1x64xf32> to vector<128x64xf32>
    %137 = arith.addf %135, %136 : vector<128x64xf32>
    %cst_59 = arith.constant 0.000000e+00 : f32
    %138 = vector.broadcast %cst_59 : f32 to vector<128x64xf32>
    %139 = arith.cmpf oge, %137, %138 : vector<128x64xf32>
    %cst_60 = arith.constant 0.00999999977 : f32
    %140 = vector.broadcast %cst_60 : f32 to vector<128x64xf32>
    %141 = arith.mulf %140, %137 : vector<128x64xf32>
    %142 = arith.select %139, %137, %141 : vector<128x64xi1>, vector<128x64xf32>
    %cst_61 = arith.constant dense<0.000000e+00> : vector<128x32xf32>
    %143 = tpu.matmul %142, %106, %cst_61 {dimension_numbers = #tpu.dot_dimension_numbers<[1], [0], [0], [1], [0, 0, 1, 1], [], []>} : vector<128x64xf32>, vector<64x32xf32>, vector<128x32xf32> -> vector<128x32xf32>
    %144 = vector.broadcast %108 : vector<1x32xf32> to vector<128x32xf32>
    %145 = arith.addf %143, %144 : vector<128x32xf32>
    %cst_62 = arith.constant 0.000000e+00 : f32
    %146 = vector.broadcast %cst_62 : f32 to vector<128x32xf32>
    %147 = arith.cmpf oge, %145, %146 : vector<128x32xf32>
    %cst_63 = arith.constant 0.00999999977 : f32
    %148 = vector.broadcast %cst_63 : f32 to vector<128x32xf32>
    %149 = arith.mulf %148, %145 : vector<128x32xf32>
    %150 = arith.select %147, %145, %149 : vector<128x32xi1>, vector<128x32xf32>
    %151 = vector.broadcast %110 : vector<1x32xf32> to vector<128x32xf32>
    %152 = arith.mulf %150, %151 : vector<128x32xf32>
    %cst_64 = arith.constant dense<0.000000e+00> : vector<128xf32>
    %153 = vector.multi_reduction <add>, %152, %cst_64 [1] : vector<128x32xf32> to vector<128xf32>
    %154 = vector.shape_cast %153 : vector<128xf32> to vector<128x1xf32>
    %155 = vector.broadcast %112 : vector<1x1xf32> to vector<128x1xf32>
    %156 = arith.addf %154, %155 : vector<128x1xf32>
    %157 = vector.broadcast %156 : vector<128x1xf32> to vector<128x16xf32>
    %158 = arith.mulf %157, %7 : vector<128x16xf32>
    %cst_65 = arith.constant dense<0.000000e+00> : vector<16x16xf32>
    %159 = tpu.matmul %4, %158, %cst_65 {dimension_numbers = #tpu.dot_dimension_numbers<[1], [0], [0], [1], [0, 0, 1, 1], [], []>} : vector<16x128xf32>, vector<128x16xf32>, vector<16x16xf32> -> vector<16x16xf32>
    %160 = arith.subf %159, %9 : vector<16x16xf32>
    %cst_66 = arith.constant dense<0xFF800000> : vector<16xf32>
    %161 = vector.multi_reduction <maximumf>, %160, %cst_66 [1] : vector<16x16xf32> to vector<16xf32>
    %162 = vector.shape_cast %161 : vector<16xf32> to vector<16x1xf32>
    %163 = vector.broadcast %162 : vector<16x1xf32> to vector<16x16xf32>
    %164 = arith.subf %160, %163 : vector<16x16xf32>
    %165 = math.exp %164 : vector<16x16xf32>
    %cst_67 = arith.constant dense<0.000000e+00> : vector<16xf32>
    %166 = vector.multi_reduction <add>, %165, %cst_67 [1] : vector<16x16xf32> to vector<16xf32>
    %167 = vector.shape_cast %166 : vector<16xf32> to vector<16x1xf32>
    %168 = vector.broadcast %167 : vector<16x1xf32> to vector<16x16xf32>
    %169 = arith.divf %165, %168 : vector<16x16xf32>
    %cst_68 = arith.constant dense<0.000000e+00> : vector<16x32xf32>
    %170 = tpu.matmul %169, %95, %cst_68 {dimension_numbers = #tpu.dot_dimension_numbers<[1], [0], [0], [1], [0, 0, 1, 1], [], []>} : vector<16x16xf32>, vector<16x32xf32>, vector<16x32xf32> -> vector<16x32xf32>
    %171 = tpu.concatenate %95, %170 in 1 : vector<16x32xf32>, vector<16x32xf32> -> vector<16x64xf32>
    %cst_69 = arith.constant dense<0.000000e+00> : vector<16x4xf32>
    %172 = tpu.matmul %171, %114, %cst_69 {dimension_numbers = #tpu.dot_dimension_numbers<[1], [0], [0], [1], [0, 0, 1, 1], [], []>} : vector<16x64xf32>, vector<64x4xf32>, vector<16x4xf32> -> vector<16x4xf32>
    %173 = vector.broadcast %116 : vector<1x4xf32> to vector<16x4xf32>
    %174 = arith.addf %172, %173 : vector<16x4xf32>
    %175 = tpu.concatenate %84, %169, %174 in 1 : vector<16x16xf32>, vector<16x16xf32>, vector<16x4xf32> -> vector<16x36xf32>
    %cst_70 = arith.constant 0.000000e+00 : f32
    %176 = vector.broadcast %cst_70 : f32 to vector<16x92xf32>
    %177 = tpu.concatenate %175, %176 in 1 : vector<16x36xf32>, vector<16x92xf32> -> vector<16x128xf32>
    %c0_71 = arith.constant 0 : index
    %c0_72 = arith.constant 0 : index
    %178 = vector.load %arg4[%c0_71, %c0_72] : memref<16x128xf32, #tpu.memory_space<vmem>>, vector<16x128xf32>
    tpu.vector_store %arg4[%c0_71, %c0_72], %177 {strides = array<i32>} : memref<16x128xf32, #tpu.memory_space<vmem>>, vector<16x128xf32>,
    return
  }
  func.func @transform_0(%arg0: i32) -> (i32, i32) {
    %c0_i32 = arith.constant 0 : i32
    %c0_i32_0 = arith.constant 0 : i32
    %c0_i32_1 = arith.constant 0 : i32
    return %c0_i32, %c0_i32_0 : i32, i32
  }
  func.func @transform_1(%arg0: i32) -> (i32, i32) {
    %c0_i32 = arith.constant 0 : i32
    %c0_i32_0 = arith.constant 0 : i32
    %c0_i32_1 = arith.constant 0 : i32
    return %c0_i32, %c0_i32_0 : i32, i32
  }
  func.func @transform_2(%arg0: i32) -> (i32, i32) {
    %c0_i32 = arith.constant 0 : i32
    %c0_i32_0 = arith.constant 0 : i32
    %c0_i32_1 = arith.constant 0 : i32
    return %c0_i32, %c0_i32_0 : i32, i32
  }
  func.func @transform_3(%arg0: i32) -> (i32, i32) {
    %c0_i32 = arith.constant 0 : i32
    %c0_i32_0 = arith.constant 0 : i32
    %c0_i32_1 = arith.constant 0 : i32
    return %c0_i32, %c0_i32_0 : i32, i32
  }
}

</mosaic_0001>

<bundles_post_ra>
// kernel: feature_reweighting_forward.1
= control target key start
LH: loop header
LB: loop body
LE: loop exit
PB: predicated region body
PF: predicated region fallthrough
CT: control target
= control target key end

     0   :  { %vm123_vm0 = vcmask 130048   ;;  %vm582_vm3 = vcmask 523264   ;;  %s4698_s17 = smov 16   ;;  %s4699_s27 = smov 32   ;;  %s5693_s0 = inlined_call_operand.vmem [shape: f32[16,16], index: 0, kind: input, shape index: {}]   ;;  %s5694_s1 = inlined_call_operand.vmem [shape: bf16[272,128], index: 1, kind: input, shape index: {}]   ;;  %s5695_s2 = inlined_call_operand.vmem [shape: f32[656,64], index: 2, kind: input, shape index: {}]   ;;  %s5696_s3 = inlined_call_operand.vmem [shape: f32[16,128], index: 3, kind: output, shape index: {}]  }
   0x1   :  { %v84_v0 = vld [vmem:[%s5693_s0] sm:$0xff]  ;;  %v85_v1 = vld [vmem:[%s5693_s0 + $0x8] sm:$0xff]  ;;  %v4749_v8 = vld [vmem:[%s5694_s1 + $0x10] sm:$0xff]  }
   0x2   :  { %v4729_v2 = vld [vmem:[%s5694_s1] sm:$0xff]   ;;  %v4731_v3 = vpack.c.bf16 %v85_v1, %v84_v0  ;;  %v4737_v5 = vld [vmem:[%s5694_s1 + $0x8] sm:$0xff]   ;;  %v3638_v10 = vunpack.c.l.bf16 %v4749_v8  ;;  %v4762_v11 = vld [vmem:[%s5694_s1 + $0x18] sm:$0xff]   ;;  %v3639_v12 = vunpack.c.h.bf16 %v4749_v8 }
   0x3   :  { %v3630_v4 = vunpack.c.l.bf16 %v4729_v2  ;;  %v3631_v6 = vunpack.c.h.bf16 %v4729_v2  ;;  %v3634_v7 = vunpack.c.l.bf16 %v4737_v5  ;;  %v3635_v9 = vunpack.c.h.bf16 %v4737_v5  ;;  %v4775_v14 = vld [vmem:[%s5694_s1 + $0x20] sm:$0xff]   ;;  %v4788_v17 = vld [vmem:[%s5694_s1 + $0x28] sm:$0xff]   ;;  %v4801_v20 = vld [vmem:[%s5694_s1 + $0x30] sm:$0xff]  }
   0x4   :  { %4461 = vmatprep.subr.bf16.mxu0 %v4731_v3  ;;  %v3642_v13 = vunpack.c.l.bf16 %v4762_v11  ;;  %v3643_v15 = vunpack.c.h.bf16 %v4762_v11  ;;  %v3646_v16 = vunpack.c.l.bf16 %v4775_v14  ;;  %v3647_v18 = vunpack.c.h.bf16 %v4775_v14  ;;  %v4814_v23 = vld [vmem:[%s5694_s1 + $0x38] sm:$0xff]   ;;  %v86_v27 = vld [vmem:[%s5695_s2 + $0x10] sm:$0xff]  ;;  %v89_v30 = vld [vmem:[%s5695_s2 + $0x20] sm:$0xff] }
   0x5   :  { %3994 = vmatprep.mubr.msk.f32.mxu0 %vm123_vm0, %v3630_v4  ;;  %4463 = vmatpush3.bf16.msra.mxu0 %v4731_v3  ;;  %v3650_v19 = vunpack.c.l.bf16 %v4788_v17  ;;  %v3651_v21 = vunpack.c.h.bf16 %v4788_v17  ;;  %v3654_v22 = vunpack.c.l.bf16 %v4801_v20  ;;  %v3655_v24 = vunpack.c.h.bf16 %v4801_v20  ;;  %v87_v28 = vld [vmem:[%s5695_s2 + $0x18] sm:$0xff]  ;;  %v90_v31 = vld [vmem:[%s5695_s2 + $0x28] sm:$0xff]  ;;  %v91_v32 = vld [vmem:[%s5695_s2 + $0x30] sm:$0xff] }
   0x6   :  { %v3658_v25 = vunpack.c.l.bf16 %v4814_v23  ;;  %v3659_v26 = vunpack.c.h.bf16 %v4814_v23  ;;  %v4464_v29 = vpack.c.bf16 %v87_v28, %v86_v27  ;;  %v4468_v33 = vpack.c.bf16 %v90_v31, %v89_v30  ;;  %v92_v34 = vld [vmem:[%s5695_s2 + $0x38] sm:$0xff]  ;;  %v93_v36 = vld [vmem:[%s5695_s2 + $0x40] sm:$0xff]  ;;  %v94_v37 = vld [vmem:[%s5695_s2 + $0x48] sm:$0xff] }
   0x7   :  { %v4472_v35 = vpack.c.bf16 %v92_v34, %v91_v32  ;;  %v4476_v38 = vpack.c.bf16 %v94_v37, %v93_v36  ;;  %v95_v32 = vld [vmem:[%s5695_s2 + $0x50] sm:$0xff]  ;;  %v99_v36 = vld [vmem:[%s5695_s2 + $0x68] sm:$0xff]  ;;  %v1796_v8 = vld [vmem:[%s5695_s2 + $0x160] sm:$0xff] }
   0x8   :  { %3995 = vmatmul.mubr.msk.f32.vlgmr.msra.gmra.mrb[0].mxu0 %vm123_vm0, %v3631_v6  ;;  %4465 = vmatprep.subr.bf16.mxu1 %v4464_v29  ;;  %v100_v37 = vld [vmem:[%s5695_s2 + $0x70] sm:$0xff]  ;;  %v1792_v2 = vld [vmem:[%s5695_s2 + $0x148] sm:$0xff]  ;;  %v1800_v14 = vld [vmem:[%s5695_s2 + $0x180] sm:$0xff] }
   0x9   :  { %3997 = vmatprep.mubr.msk.f32.mxu0 %vm123_vm0, %v3634_v7  ;;  %4467 = vmatpush3.bf16.msra.mxu1 %v4464_v29  ;;  %v1793_v5 = vld [vmem:[%s5695_s2 + $0x150] sm:$0xff] }
   0xa   :  { %4469 = vmatprep.subr.bf16.mxu0 %v4468_v33  ;;  %v1798_v11 = vld [vmem:[%s5695_s2 + $0x170] sm:$0xff] }
   0xb   :  { %4471 = vmatpush3.bf16.msra.mxu0 %v4468_v33  ;;  %v96_v33 = vld [vmem:[%s5695_s2 + $0x58] sm:$0xff] }
   0xc   :  { %3998 = vmatmul.mubr.msk.f32.gmra.mrb[2].mxu0 %vm123_vm0, %v3635_v9  ;;  %4473 = vmatprep.subr.bf16.mxu0 %v4472_v35  ;;  %v4480_v34 = vpack.c.bf16 %v96_v33, %v95_v32 }
   0xd   :  { %4000 = vmatprep.mubr.msk.f32.mxu0 %vm123_vm0, %v3638_v10 }
   0xf   :  { %4475 = vmatpush3.bf16.msra.mxu0 %v4472_v35  ;;  %v98_v35 = vld [vmem:[%s5695_s2 + $0x60] sm:$0xff] }
  0x10   :  { %4001 = vmatmul.mubr.msk.f32.gmra.mrb[4].mxu0 %vm123_vm0, %v3639_v12  ;;  %4477 = vmatprep.subr.bf16.mxu0 %v4476_v38 }
  0x11   :  { %4003 = vmatprep.mubr.msk.f32.mxu0 %vm123_vm0, %v3642_v13 }
  0x13   :  { %4479 = vmatpush3.bf16.msra.mxu0 %v4476_v38  ;;  %v4484_v38 = vpack.c.bf16 %v99_v36, %v98_v35 }
  0x14   :  { %4004 = vmatmul.mubr.msk.f32.gmra.mrb[6].mxu0 %vm123_vm0, %v3643_v15  ;;  %4481 = vmatprep.subr.bf16.mxu0 %v4480_v34 }
  0x15   :  { %4006 = vmatprep.mubr.msk.f32.mxu0 %vm123_vm0, %v3646_v16  ;;  %4485 = vmatprep.subr.bf16.mxu1 %v4484_v38 }
  0x17   :  { %4483 = vmatpush3.bf16.msra.mxu0 %v4480_v34 }
  0x18   :  { %4007 = vmatmul.mubr.msk.f32.gmra.mrb[8].mxu0 %vm123_vm0, %v3647_v18 }
  0x19   :  { %4009 = vmatprep.mubr.msk.f32.mxu0 %vm123_vm0, %v3650_v19 }
  0x1c   :  { %4010 = vmatmul.mubr.msk.f32.gmra.mrb[10].mxu0 %vm123_vm0, %v3651_v21 }
  0x1d   :  { %4012 = vmatprep.mubr.msk.f32.mxu0 %vm123_vm0, %v3654_v22 }
  0x20   :  { %4013 = vmatmul.mubr.msk.f32.gmra.mrb[12].mxu0 %vm123_vm0, %v3655_v24 }
  0x21   :  { %4015 = vmatprep.mubr.msk.f32.mxu0 %vm123_vm0, %v3658_v25 }
  0x24   :  { %4016 = vmatmul.mubr.msk.f32.gmra.mrb[14].mxu0 %vm123_vm0, %v3659_v26 }
  0xdb   :  { %v3996_v39 = vpop.f32.mrb[0].mxu0 }
  0xdc   :  { %v238_v40 = vpop.f32.mrb[1].mxu0  ;;  %v318_v42 = vand.u32 2147483647, %v3996_v39  ;;  %v101_v39 = vld [vmem:[%s5695_s2 + $0x78] sm:$0xff] }
  0xdd   :  { %v317_v41 = vand.u32 2147483647, %v238_v40  ;;  %v4488_v40 = vpack.c.bf16 %v101_v39, %v100_v37 }
  0xdf   :  { %v3999_v43 = vpop.f32.mrb[2].mxu0  ;;  %4022 = vmatprep.mubr.msk.f32.mxu1 %vm123_vm0, %v317_v41  ;;  %v102_v41 = vld [vmem:[%s5695_s2 + $0x80] sm:$0xff] }
  0xe0   :  { %v320_v44 = vand.u32 2147483647, %v3999_v43  ;;  %v248_v45 = vpop.f32.mrb[3].mxu0  ;;  %4023 = vmatmul.mubr.msk.f32.vlgmr.msra.gmra.mrb[0].mxu1 %vm123_vm0, %v318_v42  ;;  %v103_v42 = vld [vmem:[%s5695_s2 + $0x88] sm:$0xff] }
  0xe1   :  { %v319_v46 = vand.u32 2147483647, %v248_v45  ;;  %4487 = vmatpush3.bf16.msra.mxu1 %v4484_v38  ;;  %v4492_v43 = vpack.c.bf16 %v103_v42, %v102_v41 }
  0xe2   :  { %4489 = vmatprep.subr.bf16.mxu1 %v4488_v40 }
  0xe3   :  { %v4002_v47 = vpop.f32.mrb[4].mxu0  ;;  %4025 = vmatprep.mubr.msk.f32.mxu1 %vm123_vm0, %v319_v46 }
  0xe4   :  { %v322_v48 = vand.u32 2147483647, %v4002_v47  ;;  %v258_v49 = vpop.f32.mrb[5].mxu0  ;;  %4026 = vmatmul.mubr.msk.f32.gmra.mrb[2].mxu1 %vm123_vm0, %v320_v44  ;;  %v333_v44 = vlaneseq  ;;  %v88_v47 = vld [vmem:[%s5695_s2 + $0x108] sm:$0xff] }
  0xe5   :  { %v321_v50 = vand.u32 2147483647, %v258_v49  ;;  %4491 = vmatpush3.bf16.msra.mxu1 %v4488_v40 }
  0xe6   :  { %4493 = vmatprep.subr.bf16.mxu1 %v4492_v43  ;;  %v334_v45 = vshrl.u32 %v333_v44, 7 }
  0xe7   :  { %v4005_v51 = vpop.f32.mrb[6].mxu0  ;;  %4028 = vmatprep.mubr.msk.f32.mxu1 %vm123_vm0, %v321_v50 }
  0xe8   :  { %v324_v52 = vand.u32 2147483647, %v4005_v51  ;;  %v268_v53 = vpop.f32.mrb[7].mxu0  ;;  %4029 = vmatmul.mubr.msk.f32.gmra.mrb[4].mxu1 %vm123_vm0, %v322_v48  ;;  %v4898_v46 = vsub.s32 0, %v334_v45 }
  0xe9   :  { %v323_v54 = vand.u32 2147483647, %v268_v53  ;;  %4495 = vmatpush3.bf16.msra.mxu1 %v4492_v43 }
  0xea   :  { %v4904_v48 = vrot.slane %v88_v47, %v4898_v46 }
  0xeb   :  { %v4008_v55 = vpop.f32.mrb[8].mxu0  ;;  %4031 = vmatprep.mubr.msk.f32.mxu1 %vm123_vm0, %v323_v54 }
  0xec   :  { %v326_v56 = vand.u32 2147483647, %v4008_v55  ;;  %v278_v57 = vpop.f32.mrb[9].mxu0  ;;  %4032 = vmatmul.mubr.msk.f32.gmra.mrb[6].mxu1 %vm123_vm0, %v324_v52 }
  0xed   :  { %v325_v58 = vand.u32 2147483647, %v278_v57 }
  0xef   :  { %v4011_v59 = vpop.f32.mrb[10].mxu0  ;;  %4034 = vmatprep.mubr.msk.f32.mxu1 %vm123_vm0, %v325_v58 }
  0xf0   :  { %v328_v60 = vand.u32 2147483647, %v4011_v59  ;;  %v288_v61 = vpop.f32.mrb[11].mxu0  ;;  %4035 = vmatmul.mubr.msk.f32.gmra.mrb[8].mxu1 %vm123_vm0, %v326_v56 }
  0xf1   :  { %v327_v62 = vand.u32 2147483647, %v288_v61 }
  0xf3   :  { %v4014_v63 = vpop.f32.mrb[12].mxu0  ;;  %4037 = vmatprep.mubr.msk.f32.mxu1 %vm123_vm0, %v327_v62 }
  0xf4   :  { %v330_v0 = vand.u32 2147483647, %v4014_v63  ;;  %v298_v1 = vpop.f32.mrb[13].mxu0  ;;  %4038 = vmatmul.mubr.msk.f32.gmra.mrb[10].mxu1 %vm123_vm0, %v328_v60 }
  0xf5   :  { %v329_v27 = vand.u32 2147483647, %v298_v1 }
  0xf7   :  { %v4017_v28 = vpop.f32.mrb[14].mxu0  ;;  %4040 = vmatprep.mubr.msk.f32.mxu1 %vm123_vm0, %v329_v27 }
  0xf8   :  { %v332_v29 = vand.u32 2147483647, %v4017_v28  ;;  %v308_v30 = vpop.f32.mrb[15].mxu0  ;;  %4041 = vmatmul.mubr.msk.f32.gmra.mrb[12].mxu1 %vm123_vm0, %v330_v0 }
  0xf9   :  { %v331_v31 = vand.u32 2147483647, %v308_v30 }
  0xfb   :  { %4043 = vmatprep.mubr.msk.f32.mxu1 %vm123_vm0, %v331_v31 }
  0xfc   :  { %4044 = vmatmul.mubr.msk.f32.gmra.mrb[14].mxu1 %vm123_vm0, %v332_v29 }
 0x1b3   :  { %v4024_v49 = vpop.f32.mrb[0].mxu1 }
 0x1b4   :  { %v457_v50 = vadd.f32 %v4024_v49, %v4904_v48  ;;  %v451_v51 = vpop.f32.mrb[1].mxu1 }
 0x1b5   :  { %v452_v52 = vadd.f32 %v451_v51, %v4904_v48 }
 0x1b6   :  { %v547_v53 = vmul.f32 0.01, %v457_v50  ;;  %vm531_vm1 = vcmp.ge.f32.partialorder %v457_v50, 0.0 }
 0x1b7   :  { %vm530_vm2 = vcmp.ge.f32.partialorder %v452_v52, 0.0  ;;  %v546_v54 = vmul.f32 0.01, %v452_v52  ;;  %v4027_v55 = vpop.f32.mrb[2].mxu1 }
 0x1b8   :  { %v467_v56 = vadd.f32 %v4027_v55, %v4904_v48  ;;  %v461_v57 = vpop.f32.mrb[3].mxu1  ;;  %v563_v60 = vsel %vm531_vm1, %v457_v50, %v547_v53 }
 0x1b9   :  { %v462_v58 = vadd.f32 %v461_v57, %v4904_v48  ;;  %v562_v59 = vsel %vm530_vm2, %v452_v52, %v546_v54 }
 0x1ba   :  { %vm533_vm4 = vcmp.ge.f32.partialorder %v467_v56, 0.0  ;;  %v549_v61 = vmul.f32 0.01, %v467_v56  ;;  %4062 = vmatprep.mubr.msk.f32.mxu0 %vm582_vm3, %v562_v59 }
 0x1bb   :  { %vm532_vm5 = vcmp.ge.f32.partialorder %v462_v58, 0.0  ;;  %v548_v62 = vmul.f32 0.01, %v462_v58  ;;  %v4030_v63 = vpop.f32.mrb[4].mxu1  ;;  %4063 = vmatmul.mubr.msk.f32.vlgmr.msra.gmra.mrb[16].mxu0 %vm582_vm3, %v563_v60 }
 0x1bc   :  { %v477_v0 = vadd.f32 %v4030_v63, %v4904_v48  ;;  %v471_v1 = vpop.f32.mrb[5].mxu1  ;;  %v565_v27 = vsel %vm533_vm4, %v467_v56, %v549_v61 }
 0x1bd   :  { %v472_v28 = vadd.f32 %v471_v1, %v4904_v48  ;;  %v564_v29 = vsel %vm532_vm5, %v462_v58, %v548_v62 }
 0x1be   :  { %vm535_vm6 = vcmp.ge.f32.partialorder %v477_v0, 0.0  ;;  %v551_v30 = vmul.f32 0.01, %v477_v0  ;;  %4065 = vmatprep.mubr.msk.f32.mxu0 %vm582_vm3, %v564_v29 }
 0x1bf   :  { %vm534_vm7 = vcmp.ge.f32.partialorder %v472_v28, 0.0  ;;  %v550_v31 = vmul.f32 0.01, %v472_v28  ;;  %v4033_v32 = vpop.f32.mrb[6].mxu1  ;;  %4066 = vmatmul.mubr.msk.f32.gmra.mrb[18].mxu0 %vm582_vm3, %v565_v27 }
 0x1c0   :  { %v487_v33 = vadd.f32 %v4033_v32, %v4904_v48  ;;  %v481_v34 = vpop.f32.mrb[7].mxu1  ;;  %v567_v35 = vsel %vm535_vm6, %v477_v0, %v551_v30 }
 0x1c1   :  { %v482_v36 = vadd.f32 %v481_v34, %v4904_v48  ;;  %v566_v37 = vsel %vm534_vm7, %v472_v28, %v550_v31 }
 0x1c2   :  { %vm537_vm8 = vcmp.ge.f32.partialorder %v487_v33, 0.0  ;;  %v553_v38 = vmul.f32 0.01, %v487_v33  ;;  %4068 = vmatprep.mubr.msk.f32.mxu0 %vm582_vm3, %v566_v37  ;;  %v104_v37 = vld [vmem:[%s5695_s2 + $0x90] sm:$0xff] }
 0x1c3   :  { %vm536_vm9 = vcmp.ge.f32.partialorder %v482_v36, 0.0  ;;  %v552_v39 = vmul.f32 0.01, %v482_v36  ;;  %v4036_v40 = vpop.f32.mrb[8].mxu1  ;;  %4069 = vmatmul.mubr.msk.f32.gmra.mrb[20].mxu0 %vm582_vm3, %v567_v35 }
 0x1c4   :  { %v497_v41 = vadd.f32 %v4036_v40, %v4904_v48  ;;  %v491_v42 = vpop.f32.mrb[9].mxu1  ;;  %v569_v43 = vsel %vm537_vm8, %v487_v33, %v553_v38  ;;  %v108_v40 = vld [vmem:[%s5695_s2 + $0xa8] sm:$0xff] }
 0x1c5   :  { %v492_v44 = vadd.f32 %v491_v42, %v4904_v48  ;;  %v568_v45 = vsel %vm536_vm9, %v482_v36, %v552_v39  ;;  %v107_v39 = vld [vmem:[%s5695_s2 + $0xa0] sm:$0xff] }
 0x1c6   :  { %vm539_vm10 = vcmp.ge.f32.partialorder %v497_v41, 0.0  ;;  %v555_v47 = vmul.f32 0.01, %v497_v41  ;;  %4071 = vmatprep.mubr.msk.f32.mxu0 %vm582_vm3, %v568_v45  ;;  %v4500_v42 = vpack.c.bf16 %v108_v40, %v107_v39  ;;  %v111_v45 = vld [vmem:[%s5695_s2 + $0xc0] sm:$0xff] }
 0x1c7   :  { %vm538_vm11 = vcmp.ge.f32.partialorder %v492_v44, 0.0  ;;  %v554_v49 = vmul.f32 0.01, %v492_v44  ;;  %v4039_v50 = vpop.f32.mrb[10].mxu1  ;;  %4072 = vmatmul.mubr.msk.f32.gmra.mrb[22].mxu0 %vm582_vm3, %v569_v43  ;;  %v110_v43 = vld [vmem:[%s5695_s2 + $0xb8] sm:$0xff] }
 0x1c8   :  { %v507_v51 = vadd.f32 %v4039_v50, %v4904_v48  ;;  %v501_v52 = vpop.f32.mrb[11].mxu1  ;;  %v571_v53 = vsel %vm539_vm10, %v497_v41, %v555_v47  ;;  %v109_v41 = vld [vmem:[%s5695_s2 + $0xb0] sm:$0xff]  ;;  %v112_v47 = vld [vmem:[%s5695_s2 + $0xc8] sm:$0xff]  ;;  %4501 = vmatprep.subr.bf16.mxu0 %v4500_v42 }
 0x1c9   :  { %v502_v54 = vadd.f32 %v501_v52, %v4904_v48  ;;  %v570_v55 = vsel %vm538_vm11, %v492_v44, %v554_v49  ;;  %v4504_v44 = vpack.c.bf16 %v110_v43, %v109_v41  ;;  %4503 = vmatpush3.bf16.msra.mxu0 %v4500_v42  ;;  %v4508_v49 = vpack.c.bf16 %v112_v47, %v111_v45  ;;  %v97_v50 = vld [vmem:[%s5695_s2 + $0x110] sm:$0xff] }
 0x1ca   :  { %vm541_vm12 = vcmp.ge.f32.partialorder %v507_v51, 0.0  ;;  %v557_v56 = vmul.f32 0.01, %v507_v51  ;;  %4074 = vmatprep.mubr.msk.f32.mxu0 %vm582_vm3, %v570_v55 }
 0x1cb   :  { %vm540_vm13 = vcmp.ge.f32.partialorder %v502_v54, 0.0  ;;  %v556_v57 = vmul.f32 0.01, %v502_v54  ;;  %v4042_v58 = vpop.f32.mrb[12].mxu1  ;;  %4075 = vmatmul.mubr.msk.f32.gmra.mrb[24].mxu0 %vm582_vm3, %v571_v53  ;;  %4505 = vmatprep.subr.bf16.mxu0 %v4504_v44 }
 0x1cc   :  { %v517_v59 = vadd.f32 %v4042_v58, %v4904_v48  ;;  %v511_v60 = vpop.f32.mrb[13].mxu1  ;;  %v573_v61 = vsel %vm541_vm12, %v507_v51, %v557_v56  ;;  %v4967_v51 = vrot.slane %v97_v50, %v4898_v46 }
 0x1cd   :  { %v512_v62 = vadd.f32 %v511_v60, %v4904_v48  ;;  %v572_v63 = vsel %vm540_vm13, %v502_v54, %v556_v57  ;;  %4507 = vmatpush3.bf16.msra.mxu0 %v4504_v44 }
 0x1ce   :  { %vm543_vm14 = vcmp.ge.f32.partialorder %v517_v59, 0.0  ;;  %v559_v0 = vmul.f32 0.01, %v517_v59  ;;  %4077 = vmatprep.mubr.msk.f32.mxu0 %vm582_vm3, %v572_v63  ;;  %4509 = vmatprep.subr.bf16.mxu0 %v4508_v49 }
 0x1cf   :  { %vm542_vm15 = vcmp.ge.f32.partialorder %v512_v62, 0.0  ;;  %v558_v1 = vmul.f32 0.01, %v512_v62  ;;  %v4045_v27 = vpop.f32.mrb[14].mxu1  ;;  %4078 = vmatmul.mubr.msk.f32.gmra.mrb[26].mxu0 %vm582_vm3, %v573_v61 }
 0x1d0   :  { %v527_v28 = vadd.f32 %v4045_v27, %v4904_v48  ;;  %v521_v29 = vpop.f32.mrb[15].mxu1  ;;  %v575_v30 = vsel %vm543_vm14, %v517_v59, %v559_v0 }
 0x1d1   :  { %v522_v31 = vadd.f32 %v521_v29, %v4904_v48  ;;  %v574_v32 = vsel %vm542_vm15, %v512_v62, %v558_v1  ;;  %v105_v48 = vld [vmem:[%s5695_s2 + $0x98] sm:$0xff]  ;;  %4511 = vmatpush3.bf16.msra.mxu0 %v4508_v49 }
 0x1d2   :  { %vm545_vm1 = vcmp.ge.f32.partialorder %v527_v28, 0.0  ;;  %v561_v33 = vmul.f32 0.01, %v527_v28  ;;  %4080 = vmatprep.mubr.msk.f32.mxu0 %vm582_vm3, %v574_v32  ;;  %v4496_v38 = vpack.c.bf16 %v105_v48, %v104_v37 }
 0x1d3   :  { %vm544_vm2 = vcmp.ge.f32.partialorder %v522_v31, 0.0  ;;  %v560_v34 = vmul.f32 0.01, %v522_v31  ;;  %4081 = vmatmul.mubr.msk.f32.gmra.mrb[28].mxu0 %vm582_vm3, %v575_v30 }
 0x1d4   :  { %v577_v35 = vsel %vm545_vm1, %v527_v28, %v561_v33  ;;  %4497 = vmatprep.subr.bf16.mxu1 %v4496_v38 }
 0x1d5   :  { %v576_v36 = vsel %vm544_vm2, %v522_v31, %v560_v34  ;;  %4499 = vmatpush3.bf16.msra.mxu1 %v4496_v38 }
 0x1d6   :  { %4083 = vmatprep.mubr.msk.f32.mxu0 %vm582_vm3, %v576_v36  ;;  %4549 = vmatprep.subr.bf16.mxu1 %v4731_v3 }
 0x1d7   :  { %4084 = vmatmul.mubr.msk.f32.gmra.mrb[30].mxu0 %vm582_vm3, %v577_v35 }
 0x28e   :  { %v4064_v52 = vpop.f32.mrb[16].mxu0 }
 0x28f   :  { %v703_v53 = vadd.f32 %v4064_v52, %v4967_v51  ;;  %v697_v54 = vpop.f32.mrb[17].mxu0 }
 0x290   :  { %v698_v55 = vadd.f32 %v697_v54, %v4967_v51 }
 0x291   :  { %v793_v56 = vmul.f32 0.01, %v703_v53  ;;  %vm777_vm4 = vcmp.ge.f32.partialorder %v703_v53, 0.0 }
 0x292   :  { %vm776_vm5 = vcmp.ge.f32.partialorder %v698_v55, 0.0  ;;  %v792_v57 = vmul.f32 0.01, %v698_v55  ;;  %v4067_v58 = vpop.f32.mrb[18].mxu0 }
 0x293   :  { %v713_v59 = vadd.f32 %v4067_v58, %v4967_v51  ;;  %v707_v60 = vpop.f32.mrb[19].mxu0  ;;  %v809_v63 = vsel %vm777_vm4, %v703_v53, %v793_v56 }
 0x294   :  { %v708_v61 = vadd.f32 %v707_v60, %v4967_v51  ;;  %v808_v62 = vsel %vm776_vm5, %v698_v55, %v792_v57 }
 0x295   :  { %v795_v0 = vmul.f32 0.01, %v713_v59  ;;  %4102 = vmatprep.mubr.msk.f32.mxu1 %vm582_vm3, %v808_v62  ;;  %vm779_vm6 = vcmp.ge.f32.partialorder %v713_v59, 0.0 }
 0x296   :  { %vm778_vm7 = vcmp.ge.f32.partialorder %v708_v61, 0.0  ;;  %v794_v1 = vmul.f32 0.01, %v708_v61  ;;  %v4070_v27 = vpop.f32.mrb[20].mxu0  ;;  %4103 = vmatmul.mubr.msk.f32.vlgmr.msra.gmra.mrb[16].mxu1 %vm582_vm3, %v809_v63 }
 0x297   :  { %v723_v28 = vadd.f32 %v4070_v27, %v4967_v51  ;;  %v717_v29 = vpop.f32.mrb[21].mxu0  ;;  %4551 = vmatpush3.bf16.msra.mxu1 %v4731_v3  ;;  %v811_v33 = vsel %vm779_vm6, %v713_v59, %v795_v0 }
 0x298   :  { %v718_v30 = vadd.f32 %v717_v29, %v4967_v51  ;;  %v810_v31 = vsel %vm778_vm7, %v708_v61, %v794_v1 }
 0x299   :  { %vm781_vm8 = vcmp.ge.f32.partialorder %v723_v28, 0.0  ;;  %v797_v32 = vmul.f32 0.01, %v723_v28  ;;  %4105 = vmatprep.mubr.msk.f32.mxu1 %vm582_vm3, %v810_v31 }
 0x29a   :  { %vm780_vm9 = vcmp.ge.f32.partialorder %v718_v30, 0.0  ;;  %v796_v34 = vmul.f32 0.01, %v718_v30  ;;  %v4073_v35 = vpop.f32.mrb[22].mxu0  ;;  %4106 = vmatmul.mubr.msk.f32.gmra.mrb[18].mxu1 %vm582_vm3, %v811_v33 }
 0x29b   :  { %v733_v36 = vadd.f32 %v4073_v35, %v4967_v51  ;;  %v727_v37 = vpop.f32.mrb[23].mxu0  ;;  %v813_v48 = vsel %vm781_vm8, %v723_v28, %v797_v32 }
 0x29c   :  { %v728_v38 = vadd.f32 %v727_v37, %v4967_v51  ;;  %v812_v3 = vsel %vm780_vm9, %v718_v30, %v796_v34 }
 0x29d   :  { %vm783_vm10 = vcmp.ge.f32.partialorder %v733_v36, 0.0  ;;  %v799_v39 = vmul.f32 0.01, %v733_v36  ;;  %4108 = vmatprep.mubr.msk.f32.mxu1 %vm582_vm3, %v812_v3 }
 0x29e   :  { %vm782_vm11 = vcmp.ge.f32.partialorder %v728_v38, 0.0  ;;  %v798_v40 = vmul.f32 0.01, %v728_v38  ;;  %v4076_v41 = vpop.f32.mrb[24].mxu0  ;;  %4109 = vmatmul.mubr.msk.f32.gmra.mrb[20].mxu1 %vm582_vm3, %v813_v48 }
 0x29f   :  { %v743_v42 = vadd.f32 %v4076_v41, %v4967_v51  ;;  %v737_v43 = vpop.f32.mrb[25].mxu0  ;;  %v815_v44 = vsel %vm783_vm10, %v733_v36, %v799_v39  ;;  %v106_v39 = vld [vmem:[%s5695_s2 + $0x118] sm:$0xff] }
 0x2a0   :  { %v738_v45 = vadd.f32 %v737_v43, %v4967_v51  ;;  %v814_v47 = vsel %vm782_vm11, %v728_v38, %v798_v40  ;;  %v113_v38 = vld [vmem:[%s5695_s2 + $0xd0] sm:$0xff]  ;;  %v5012_v40 = vrot.slane %v106_v39, %v4898_v46 }
 0x2a1   :  { %vm785_vm12 = vcmp.ge.f32.partialorder %v743_v42, 0.0  ;;  %v801_v49 = vmul.f32 0.01, %v743_v42  ;;  %4111 = vmatprep.mubr.msk.f32.mxu1 %vm582_vm3, %v814_v47 }
 0x2a2   :  { %vm784_vm13 = vcmp.ge.f32.partialorder %v738_v45, 0.0  ;;  %v800_v50 = vmul.f32 0.01, %v738_v45  ;;  %v4079_v52 = vpop.f32.mrb[26].mxu0  ;;  %4112 = vmatmul.mubr.msk.f32.gmra.mrb[22].mxu1 %vm582_vm3, %v815_v44 }
 0x2a3   :  { %v753_v53 = vadd.f32 %v4079_v52, %v4967_v51  ;;  %v747_v54 = vpop.f32.mrb[27].mxu0  ;;  %v817_v55 = vsel %vm785_vm12, %v743_v42, %v801_v49 }
 0x2a4   :  { %v748_v56 = vadd.f32 %v747_v54, %v4967_v51  ;;  %v816_v57 = vsel %vm784_vm13, %v738_v45, %v800_v50 }
 0x2a5   :  { %vm787_vm14 = vcmp.ge.f32.partialorder %v753_v53, 0.0  ;;  %v803_v58 = vmul.f32 0.01, %v753_v53  ;;  %4114 = vmatprep.mubr.msk.f32.mxu1 %vm582_vm3, %v816_v57 }
 0x2a6   :  { %vm786_vm15 = vcmp.ge.f32.partialorder %v748_v56, 0.0  ;;  %v802_v59 = vmul.f32 0.01, %v748_v56  ;;  %v4082_v60 = vpop.f32.mrb[28].mxu0  ;;  %4115 = vmatmul.mubr.msk.f32.gmra.mrb[24].mxu1 %vm582_vm3, %v817_v55 }
 0x2a7   :  { %v763_v61 = vadd.f32 %v4082_v60, %v4967_v51  ;;  %v757_v62 = vpop.f32.mrb[29].mxu0  ;;  %v819_v63 = vsel %vm787_vm14, %v753_v53, %v803_v58 }
 0x2a8   :  { %v758_v0 = vadd.f32 %v757_v62, %v4967_v51  ;;  %v818_v1 = vsel %vm786_vm15, %v748_v56, %v802_v59 }
 0x2a9   :  { %vm789_vm1 = vcmp.ge.f32.partialorder %v763_v61, 0.0  ;;  %v805_v27 = vmul.f32 0.01, %v763_v61  ;;  %4117 = vmatprep.mubr.msk.f32.mxu1 %vm582_vm3, %v818_v1 }
 0x2aa   :  { %vm788_vm2 = vcmp.ge.f32.partialorder %v758_v0, 0.0  ;;  %v804_v28 = vmul.f32 0.01, %v758_v0  ;;  %v4085_v29 = vpop.f32.mrb[30].mxu0  ;;  %4118 = vmatmul.mubr.msk.f32.gmra.mrb[26].mxu1 %vm582_vm3, %v819_v63 }
 0x2ab   :  { %v773_v30 = vadd.f32 %v4085_v29, %v4967_v51  ;;  %v767_v31 = vpop.f32.mrb[31].mxu0  ;;  %v821_v32 = vsel %vm789_vm1, %v763_v61, %v805_v27 }
 0x2ac   :  { %v768_v33 = vadd.f32 %v767_v31, %v4967_v51  ;;  %v820_v34 = vsel %vm788_vm2, %v758_v0, %v804_v28  ;;  %v114_v51 = vld [vmem:[%s5695_s2 + $0xd8] sm:$0xff] }
 0x2ad   :  { %vm791_vm4 = vcmp.ge.f32.partialorder %v773_v30, 0.0  ;;  %v807_v35 = vmul.f32 0.01, %v773_v30  ;;  %4120 = vmatprep.mubr.msk.f32.mxu1 %vm582_vm3, %v820_v34  ;;  %v4512_v3 = vpack.c.bf16 %v114_v51, %v113_v38 }
 0x2ae   :  { %vm790_vm5 = vcmp.ge.f32.partialorder %v768_v33, 0.0  ;;  %v806_v36 = vmul.f32 0.01, %v768_v33  ;;  %4121 = vmatmul.mubr.msk.f32.gmra.mrb[28].mxu1 %vm582_vm3, %v821_v32 }
 0x2af   :  { %v823_v37 = vsel %vm791_vm4, %v773_v30, %v807_v35  ;;  %4513 = vmatprep.subr.bf16.mxu0 %v4512_v3 }
 0x2b0   :  { %v822_v48 = vsel %vm790_vm5, %v768_v33, %v806_v36  ;;  %4515 = vmatpush3.bf16.msra.mxu0 %v4512_v3 }
 0x2b1   :  { %4123 = vmatprep.mubr.msk.f32.mxu1 %vm582_vm3, %v822_v48 }
 0x2b2   :  { %4124 = vmatmul.mubr.msk.f32.gmra.mrb[30].mxu1 %vm582_vm3, %v823_v37 }
 0x369   :  { %v4104_v41 = vpop.f32.mrb[16].mxu1 }
 0x36a   :  { %v948_v42 = vadd.f32 %v4104_v41, %v5012_v40  ;;  %v942_v43 = vpop.f32.mrb[17].mxu1 }
 0x36b   :  { %v943_v44 = vadd.f32 %v942_v43, %v5012_v40 }
 0x36c   :  { %v1038_v45 = vmul.f32 0.01, %v948_v42  ;;  %vm1022_vm6 = vcmp.ge.f32.partialorder %v948_v42, 0.0 }
 0x36d   :  { %vm1021_vm7 = vcmp.ge.f32.partialorder %v943_v44, 0.0  ;;  %v1037_v47 = vmul.f32 0.01, %v943_v44  ;;  %v4107_v49 = vpop.f32.mrb[18].mxu1 }
 0x36e   :  { %v958_v50 = vadd.f32 %v4107_v49, %v5012_v40  ;;  %v952_v52 = vpop.f32.mrb[19].mxu1  ;;  %v1054_v55 = vsel %vm1022_vm6, %v948_v42, %v1038_v45 }
 0x36f   :  { %v953_v53 = vadd.f32 %v952_v52, %v5012_v40  ;;  %v1053_v54 = vsel %vm1021_vm7, %v943_v44, %v1037_v47 }
 0x370   :  { %v1040_v56 = vmul.f32 0.01, %v958_v50  ;;  %4142 = vmatprep.mubr.msk.f32.mxu0 %vm582_vm3, %v1053_v54  ;;  %vm1024_vm8 = vcmp.ge.f32.partialorder %v958_v50, 0.0 }
 0x371   :  { %vm1023_vm9 = vcmp.ge.f32.partialorder %v953_v53, 0.0  ;;  %v1039_v57 = vmul.f32 0.01, %v953_v53  ;;  %v4110_v58 = vpop.f32.mrb[20].mxu1  ;;  %4143 = vmatmul.mubr.msk.f32.vlgmr.msra.gmra.mrb[32].mxu0 %vm582_vm3, %v1054_v55 }
 0x372   :  { %v968_v59 = vadd.f32 %v4110_v58, %v5012_v40  ;;  %v962_v60 = vpop.f32.mrb[21].mxu1  ;;  %v1056_v0 = vsel %vm1024_vm8, %v958_v50, %v1040_v56 }
 0x373   :  { %v963_v61 = vadd.f32 %v962_v60, %v5012_v40  ;;  %v1055_v62 = vsel %vm1023_vm9, %v953_v53, %v1039_v57 }
 0x374   :  { %v1042_v63 = vmul.f32 0.01, %v968_v59  ;;  %4145 = vmatprep.mubr.msk.f32.mxu0 %vm582_vm3, %v1055_v62  ;;  %vm1026_vm10 = vcmp.ge.f32.partialorder %v968_v59, 0.0 }
 0x375   :  { %vm1025_vm11 = vcmp.ge.f32.partialorder %v963_v61, 0.0  ;;  %v1041_v1 = vmul.f32 0.01, %v963_v61  ;;  %v4113_v27 = vpop.f32.mrb[22].mxu1  ;;  %4146 = vmatmul.mubr.msk.f32.gmra.mrb[34].mxu0 %vm582_vm3, %v1056_v0 }
 0x376   :  { %v978_v28 = vadd.f32 %v4113_v27, %v5012_v40  ;;  %v972_v29 = vpop.f32.mrb[23].mxu1  ;;  %v1058_v33 = vsel %vm1026_vm10, %v968_v59, %v1042_v63  ;;  %vm1334_vm10 = vcmask 261120  }
 0x377   :  { %v973_v30 = vadd.f32 %v972_v29, %v5012_v40  ;;  %v1057_v31 = vsel %vm1025_vm11, %v963_v61, %v1041_v1 }
 0x378   :  { %vm1028_vm12 = vcmp.ge.f32.partialorder %v978_v28, 0.0  ;;  %v1044_v32 = vmul.f32 0.01, %v978_v28  ;;  %4148 = vmatprep.mubr.msk.f32.mxu0 %vm582_vm3, %v1057_v31  ;;  %v115_v31 = vld [vmem:[%s5695_s2 + $0x120] sm:$0xff] }
 0x379   :  { %vm1027_vm13 = vcmp.ge.f32.partialorder %v973_v30, 0.0  ;;  %v1043_v34 = vmul.f32 0.01, %v973_v30  ;;  %v4116_v35 = vpop.f32.mrb[24].mxu1  ;;  %4149 = vmatmul.mubr.msk.f32.gmra.mrb[36].mxu0 %vm582_vm3, %v1058_v33  ;;  %v116_v33 = vld [vmem:[%s5695_s2 + $0xe0] sm:$0xff] }
 0x37a   :  { %v988_v36 = vadd.f32 %v4116_v35, %v5012_v40  ;;  %v982_v37 = vpop.f32.mrb[25].mxu1  ;;  %v1060_v48 = vsel %vm1028_vm12, %v978_v28, %v1044_v32 }
 0x37b   :  { %v983_v38 = vadd.f32 %v982_v37, %v5012_v40  ;;  %v1059_v51 = vsel %vm1027_vm13, %v973_v30, %v1043_v34 }
 0x37c   :  { %vm1030_vm14 = vcmp.ge.f32.partialorder %v988_v36, 0.0  ;;  %v1046_v3 = vmul.f32 0.01, %v988_v36  ;;  %4151 = vmatprep.mubr.msk.f32.mxu0 %vm582_vm3, %v1059_v51 }
 0x37d   :  { %vm1029_vm15 = vcmp.ge.f32.partialorder %v983_v38, 0.0  ;;  %v1045_v39 = vmul.f32 0.01, %v983_v38  ;;  %v4119_v41 = vpop.f32.mrb[26].mxu1  ;;  %4152 = vmatmul.mubr.msk.f32.gmra.mrb[38].mxu0 %vm582_vm3, %v1060_v48  ;;  %v5058_v48 = vrot.slane %v116_v33, %v4898_v46 }
 0x37e   :  { %v998_v42 = vadd.f32 %v4119_v41, %v5012_v40  ;;  %v992_v43 = vpop.f32.mrb[27].mxu1  ;;  %v1062_v44 = vsel %vm1030_vm14, %v988_v36, %v1046_v3 }
 0x37f   :  { %v993_v45 = vadd.f32 %v992_v43, %v5012_v40  ;;  %v1061_v47 = vsel %vm1029_vm15, %v983_v38, %v1045_v39 }
 0x380   :  { %vm1032_vm1 = vcmp.ge.f32.partialorder %v998_v42, 0.0  ;;  %v1048_v49 = vmul.f32 0.01, %v998_v42  ;;  %4154 = vmatprep.mubr.msk.f32.mxu0 %vm582_vm3, %v1061_v47 }
 0x381   :  { %vm1031_vm2 = vcmp.ge.f32.partialorder %v993_v45, 0.0  ;;  %v1047_v50 = vmul.f32 0.01, %v993_v45  ;;  %v4122_v52 = vpop.f32.mrb[28].mxu1  ;;  %4155 = vmatmul.mubr.msk.f32.gmra.mrb[40].mxu0 %vm582_vm3, %v1062_v44 }
 0x382   :  { %v1008_v53 = vadd.f32 %v4122_v52, %v5012_v40  ;;  %v1002_v54 = vpop.f32.mrb[29].mxu1  ;;  %v1064_v55 = vsel %vm1032_vm1, %v998_v42, %v1048_v49 }
 0x383   :  { %v1003_v56 = vadd.f32 %v1002_v54, %v5012_v40  ;;  %v1063_v57 = vsel %vm1031_vm2, %v993_v45, %v1047_v50 }
 0x384   :  { %vm1034_vm4 = vcmp.ge.f32.partialorder %v1008_v53, 0.0  ;;  %v1050_v58 = vmul.f32 0.01, %v1008_v53  ;;  %4157 = vmatprep.mubr.msk.f32.mxu0 %vm582_vm3, %v1063_v57 }
 0x385   :  { %vm1033_vm5 = vcmp.ge.f32.partialorder %v1003_v56, 0.0  ;;  %v1049_v59 = vmul.f32 0.01, %v1003_v56  ;;  %v4125_v60 = vpop.f32.mrb[30].mxu1  ;;  %4158 = vmatmul.mubr.msk.f32.gmra.mrb[42].mxu0 %vm582_vm3, %v1064_v55 }
 0x386   :  { %v1018_v61 = vadd.f32 %v4125_v60, %v5012_v40  ;;  %v1012_v62 = vpop.f32.mrb[31].mxu1  ;;  %v1066_v63 = vsel %vm1034_vm4, %v1008_v53, %v1050_v58 }
 0x387   :  { %v1013_v0 = vadd.f32 %v1012_v62, %v5012_v40  ;;  %v1065_v1 = vsel %vm1033_vm5, %v1003_v56, %v1049_v59  ;;  %v5050_v40 = vrot.slane %v115_v31, %v4898_v46 }
 0x388   :  { %vm1036_vm6 = vcmp.ge.f32.partialorder %v1018_v61, 0.0  ;;  %v1052_v27 = vmul.f32 0.01, %v1018_v61  ;;  %4160 = vmatprep.mubr.msk.f32.mxu0 %vm582_vm3, %v1065_v1 }
 0x389   :  { %vm1035_vm7 = vcmp.ge.f32.partialorder %v1013_v0, 0.0  ;;  %v1051_v28 = vmul.f32 0.01, %v1013_v0  ;;  %4161 = vmatmul.mubr.msk.f32.gmra.mrb[44].mxu0 %vm582_vm3, %v1066_v63 }
 0x38a   :  { %v1068_v29 = vsel %vm1036_vm6, %v1018_v61, %v1052_v27 }
 0x38b   :  { %v1067_v30 = vsel %vm1035_vm7, %v1013_v0, %v1051_v28 }
 0x38c   :  { %4163 = vmatprep.mubr.msk.f32.mxu0 %vm582_vm3, %v1067_v30 }
 0x38d   :  { %4164 = vmatmul.mubr.msk.f32.gmra.mrb[46].mxu0 %vm582_vm3, %v1068_v29 }
 0x444   :  { %v4144_v32 = vpop.f32.mrb[32].mxu0 }
 0x445   :  { %v1193_v34 = vadd.f32 %v4144_v32, %v5050_v40  ;;  %v1187_v35 = vpop.f32.mrb[33].mxu0 }
 0x446   :  { %v1188_v36 = vadd.f32 %v1187_v35, %v5050_v40 }
 0x447   :  { %vm1267_vm8 = vcmp.ge.f32.partialorder %v1193_v34, 0.0  ;;  %v1283_v37 = vmul.f32 0.01, %v1193_v34 }
 0x448   :  { %v1282_v38 = vmul.f32 0.01, %v1188_v36  ;;  %v4147_v51 = vpop.f32.mrb[34].mxu0  ;;  %vm1266_vm9 = vcmp.ge.f32.partialorder %v1188_v36, 0.0 }
 0x449   :  { %v1203_v3 = vadd.f32 %v4147_v51, %v5050_v40  ;;  %v1197_v39 = vpop.f32.mrb[35].mxu0  ;;  %v1299_v43 = vsel %vm1267_vm8, %v1193_v34, %v1283_v37 }
 0x44a   :  { %v1198_v41 = vadd.f32 %v1197_v39, %v5050_v40  ;;  %v1298_v42 = vsel %vm1266_vm9, %v1188_v36, %v1282_v38  ;;  %v1319_v55 = vmul.f32 %v5058_v48, %v1299_v43 }
 0x44b   :  { %v1285_v44 = vmul.f32 0.01, %v1203_v3  ;;  %v1318_v45 = vmul.f32 %v5058_v48, %v1298_v42  ;;  %vm1269_vm11 = vcmp.ge.f32.partialorder %v1203_v3, 0.0 }
 0x44c   :  { %vm1268_vm12 = vcmp.ge.f32.partialorder %v1198_v41, 0.0  ;;  %v1284_v47 = vmul.f32 0.01, %v1198_v41  ;;  %v4150_v49 = vpop.f32.mrb[36].mxu0  ;;  %v1338_v27 = vsel %vm1334_vm10, %v1319_v55, 0.0 }
 0x44d   :  { %v1213_v50 = vadd.f32 %v4150_v49, %v5050_v40  ;;  %v1207_v52 = vpop.f32.mrb[37].mxu0  ;;  %v1335_v53 = vsel %vm1334_vm10, %v1318_v45, 0.0  ;;  %v1301_v54 = vsel %vm1269_vm11, %v1203_v3, %v1285_v44 }
 0x44e   :  { %v1208_v56 = vadd.f32 %v1207_v52, %v5050_v40  ;;  %1336 = vadd.xlane.f32.xlu0 %v1335_v53  ;;  %v1321_v57 = vmul.f32 %v5058_v48, %v1301_v54  ;;  %v1300_v58 = vsel %vm1268_vm12, %v1198_v41, %v1284_v47 }
 0x44f   :  { %vm1271_vm13 = vcmp.ge.f32.partialorder %v1213_v50, 0.0  ;;  %v1287_v59 = vmul.f32 0.01, %v1213_v50  ;;  %v1320_v63 = vmul.f32 %v5058_v48, %v1300_v58 }
 0x450   :  { %vm1270_vm14 = vcmp.ge.f32.partialorder %v1208_v56, 0.0  ;;  %v1286_v60 = vmul.f32 0.01, %v1208_v56  ;;  %v4153_v61 = vpop.f32.mrb[38].mxu0  ;;  %v1344_v62 = vsel %vm1334_vm10, %v1321_v57, 0.0 }
 0x451   :  { %v1223_v0 = vadd.f32 %v4153_v61, %v5050_v40  ;;  %1345 = vadd.xlane.f32.xlu1 %v1344_v62  ;;  %v1217_v1 = vpop.f32.mrb[39].mxu0  ;;  %v1303_v28 = vsel %vm1271_vm13, %v1213_v50, %v1287_v59  ;;  %v1341_v35 = vsel %vm1334_vm10, %v1320_v63, 0.0 }
 0x452   :  { %v1218_v29 = vadd.f32 %v1217_v1, %v5050_v40  ;;  %1339 = vadd.xlane.f32.xlu0 %v1338_v27  ;;  %v1302_v30 = vsel %vm1270_vm14, %v1208_v56, %v1286_v60  ;;  %v1323_v36 = vmul.f32 %v5058_v48, %v1303_v28  ;;  %v4697_v28 = vmov 0  }
 0x453   :  { %vm1273_vm15 = vcmp.ge.f32.partialorder %v1223_v0, 0.0  ;;  %v1289_v31 = vmul.f32 0.01, %v1223_v0  ;;  %v1322_v32 = vmul.f32 %v5058_v48, %v1302_v30  ;;  %4675 = vset.pattern.permute.xlu0 %v4697_v28  ;;  %4676 = vset.pattern.permute.xlu1 %v4697_v28 }
 0x454   :  { %vm1272_vm1 = vcmp.ge.f32.partialorder %v1218_v29, 0.0  ;;  %v1288_v33 = vmul.f32 0.01, %v1218_v29  ;;  %v4156_v34 = vpop.f32.mrb[40].mxu0  ;;  %v1350_v49 = vsel %vm1334_vm10, %v1323_v36, 0.0 }
 0x455   :  { %v1233_v37 = vadd.f32 %v4156_v34, %v5050_v40  ;;  %v1227_v38 = vpop.f32.mrb[41].mxu0  ;;  %1342 = vadd.xlane.f32.xlu1 %v1341_v35  ;;  %v1347_v51 = vsel %vm1334_vm10, %v1322_v32, 0.0  ;;  %v1305_v3 = vsel %vm1273_vm15, %v1223_v0, %v1289_v31 }
 0x456   :  { %v1228_v39 = vadd.f32 %v1227_v38, %v5050_v40  ;;  %1348 = vadd.xlane.f32.xlu0 %v1347_v51  ;;  %v1304_v41 = vsel %vm1272_vm1, %v1218_v29, %v1288_v33  ;;  %v1325_v44 = vmul.f32 %v5058_v48, %v1305_v3 }
 0x457   :  { %vm1275_vm2 = vcmp.ge.f32.partialorder %v1233_v37, 0.0  ;;  %v1291_v42 = vmul.f32 0.01, %v1233_v37  ;;  %v1324_v43 = vmul.f32 %v5058_v48, %v1304_v41 }
 0x458   :  { %vm1274_vm4 = vcmp.ge.f32.partialorder %v1228_v39, 0.0  ;;  %v1290_v45 = vmul.f32 0.01, %v1228_v39  ;;  %v4159_v47 = vpop.f32.mrb[42].mxu0  ;;  %v1356_v58 = vsel %vm1334_vm10, %v1325_v44, 0.0 }
 0x459   :  { %v1243_v50 = vadd.f32 %v4159_v47, %v5050_v40  ;;  %v1237_v52 = vpop.f32.mrb[43].mxu0  ;;  %1351 = vadd.xlane.f32.xlu1 %v1350_v49  ;;  %v1353_v53 = vsel %vm1334_vm10, %v1324_v43, 0.0  ;;  %v1307_v54 = vsel %vm1275_vm2, %v1233_v37, %v1291_v42 }
 0x45a   :  { %v1238_v55 = vadd.f32 %v1237_v52, %v5050_v40  ;;  %1354 = vadd.xlane.f32.xlu0 %v1353_v53  ;;  %v1306_v56 = vsel %vm1274_vm4, %v1228_v39, %v1290_v45  ;;  %v1327_v62 = vmul.f32 %v5058_v48, %v1307_v54 }
 0x45b   :  { %vm1277_vm5 = vcmp.ge.f32.partialorder %v1243_v50, 0.0  ;;  %v1293_v57 = vmul.f32 0.01, %v1243_v50  ;;  %v1326_v59 = vmul.f32 %v5058_v48, %v1306_v56 }
 0x45c   :  { %vm1276_vm6 = vcmp.ge.f32.partialorder %v1238_v55, 0.0  ;;  %v1292_v60 = vmul.f32 0.01, %v1238_v55  ;;  %v4162_v61 = vpop.f32.mrb[44].mxu0  ;;  %v1362_v35 = vsel %vm1334_vm10, %v1327_v62, 0.0 }
 0x45d   :  { %v1253_v63 = vadd.f32 %v4162_v61, %v5050_v40  ;;  %v1247_v0 = vpop.f32.mrb[45].mxu0  ;;  %1357 = vadd.xlane.f32.xlu1 %v1356_v58  ;;  %v1359_v1 = vsel %vm1334_vm10, %v1326_v59, 0.0  ;;  %v1309_v27 = vsel %vm1277_vm5, %v1243_v50, %v1293_v57  ;;  %v117_v57 = vld [vmem:[%s5695_s2 + $0x128] sm:$0xff] }
 0x45e   :  { %v1248_v29 = vadd.f32 %v1247_v0, %v5050_v40  ;;  %1360 = vadd.xlane.f32.xlu0 %v1359_v1  ;;  %v1308_v30 = vsel %vm1276_vm6, %v1238_v55, %v1292_v60  ;;  %v1329_v36 = vmul.f32 %v5058_v48, %v1309_v27  ;;  %v1386_v58 = vrot.slane %v117_v57, %v4898_v46 }
 0x45f   :  { %vm1279_vm7 = vcmp.ge.f32.partialorder %v1253_v63, 0.0  ;;  %v1295_v31 = vmul.f32 0.01, %v1253_v63  ;;  %v1328_v32 = vmul.f32 %v5058_v48, %v1308_v30 }
 0x460   :  { %vm1278_vm8 = vcmp.ge.f32.partialorder %v1248_v29, 0.0  ;;  %v1294_v33 = vmul.f32 0.01, %v1248_v29  ;;  %v4165_v34 = vpop.f32.mrb[46].mxu0  ;;  %v1368_v45 = vsel %vm1334_vm10, %v1329_v36, 0.0 }
 0x461   :  { %v1263_v37 = vadd.f32 %v4165_v34, %v5050_v40  ;;  %1363 = vadd.xlane.f32.xlu1 %v1362_v35  ;;  %v1257_v38 = vpop.f32.mrb[47].mxu0  ;;  %v1365_v51 = vsel %vm1334_vm10, %v1328_v32, 0.0  ;;  %v1311_v3 = vsel %vm1279_vm7, %v1253_v63, %v1295_v31 }
 0x462   :  { %v1258_v39 = vadd.f32 %v1257_v38, %v5050_v40  ;;  %1366 = vadd.xlane.f32.xlu0 %v1365_v51  ;;  %v1310_v41 = vsel %vm1278_vm8, %v1248_v29, %v1294_v33  ;;  %v1331_v47 = vmul.f32 %v5058_v48, %v1311_v3 }
 0x463   :  { %vm1281_vm9 = vcmp.ge.f32.partialorder %v1263_v37, 0.0  ;;  %v1297_v42 = vmul.f32 0.01, %v1263_v37  ;;  %v1330_v43 = vmul.f32 %v5058_v48, %v1310_v41 }
 0x464   :  { %vm1280_vm11 = vcmp.ge.f32.partialorder %v1258_v39, 0.0  ;;  %v1296_v44 = vmul.f32 0.01, %v1258_v39  ;;  %v1374_v53 = vsel %vm1334_vm10, %v1331_v47, 0.0 }
 0x465   :  { %1369 = vadd.xlane.f32.xlu1 %v1368_v45  ;;  %v1371_v49 = vsel %vm1334_vm10, %v1330_v43, 0.0  ;;  %v1313_v50 = vsel %vm1281_vm9, %v1263_v37, %v1297_v42 }
 0x466   :  { %1372 = vadd.xlane.f32.xlu0 %v1371_v49  ;;  %v1312_v52 = vsel %vm1280_vm11, %v1258_v39, %v1296_v44  ;;  %v1333_v54 = vmul.f32 %v5058_v48, %v1313_v50 }
 0x467   :  { %v1332_v40 = vmul.f32 %v5058_v48, %v1312_v52 }
 0x468   :  { %v1380_v56 = vsel %vm1334_vm10, %v1333_v54, 0.0  ;;  %v5121_v54 = vld [vmem:[%s5694_s1 + $0x48] sm:$0xff]  }
 0x469   :  { %1375 = vadd.xlane.f32.xlu1 %v1374_v53  ;;  %v1377_v55 = vsel %vm1334_vm10, %v1332_v40, 0.0  ;;  %v5113_v40 = vld [vmem:[%s5694_s1 + $0x40] sm:$0xff]  }
 0x46a   :  { %1378 = vadd.xlane.f32.xlu0 %v1377_v55  ;;  %v3662_v53 = vunpack.c.l.bf16 %v5113_v40  ;;  %v3666_v55 = vunpack.c.l.bf16 %v5121_v54 }
 0x46c   :  { %4198 = vmatprep.mubr.f32.mxu0 %v3662_v53 }
 0x46d   :  { %1381 = vadd.xlane.f32.xlu1 %v1380_v56  ;;  %v3667_v56 = vunpack.c.h.bf16 %v5121_v54 }
 0x4db   :  { %v1337_v59 = vpop.xlane.xlu0 %1336 }
 0x4dc   :  { %v1387_v60 = vadd.f32 %v1386_v58, %v1337_v59 }
 0x4de   :  { %v1346_v61 = vpop.xlane.xlu1 %1345  ;;  %1405 = vperm.xlu0 %4675, %v1387_v60  }
 0x4df   :  { %v1340_v62 = vpop.xlane.xlu0 %1339  ;;  %v1390_v0 = vadd.f32 %v1386_v58, %v1346_v61  ;;  %v5132_v61 = vld [vmem:[%s5694_s1 + $0x50] sm:$0xff]  }
 0x4e0   :  { %v1388_v63 = vadd.f32 %v1386_v58, %v1340_v62 }
 0x4e2   :  { %v1343_v48 = vpop.xlane.xlu1 %1342  ;;  %1410 = vperm.xlu1 %4676, %v1388_v63  }
 0x4e3   :  { %v1349_v27 = vpop.xlane.xlu0 %1348  ;;  %v1389_v28 = vadd.f32 %v1386_v58, %v1343_v48  ;;  %v3671_v48 = vunpack.c.h.bf16 %v5132_v61 }
 0x4e4   :  { %v1391_v34 = vadd.f32 %v1386_v58, %v1349_v27 }
 0x4e6   :  { %v1352_v1 = vpop.xlane.xlu1 %1351  ;;  %1420 = vperm.xlu1 %4676, %v1390_v0   ;;  %v3670_v0 = vunpack.c.l.bf16 %v5132_v61 }
 0x4e7   :  { %v1392_v30 = vadd.f32 %v1386_v58, %v1352_v1  ;;  %v1355_v31 = vpop.xlane.xlu0 %1354 }
 0x4e8   :  { %v1393_v39 = vadd.f32 %v1386_v58, %v1355_v31 }
 0x4ea   :  { %v1358_v29 = vpop.xlane.xlu1 %1357  ;;  %1415 = vperm.xlu1 %4676, %v1389_v28  }
 0x4eb   :  { %v1361_v36 = vpop.xlane.xlu0 %1360  ;;  %v1394_v38 = vadd.f32 %v1386_v58, %v1358_v29  ;;  %v5143_v29 = vld [vmem:[%s5694_s1 + $0x58] sm:$0xff]  }
 0x4ec   :  { %v1395_v44 = vadd.f32 %v1386_v58, %v1361_v36 }
 0x4ee   :  { %v1364_v32 = vpop.xlane.xlu1 %1363  ;;  %1430 = vperm.xlu1 %4676, %v1392_v30  }
 0x4ef   :  { %v1396_v33 = vadd.f32 %v1386_v58, %v1364_v32  ;;  %v1367_v41 = vpop.xlane.xlu0 %1366  ;;  %v3675_v32 = vunpack.c.h.bf16 %v5143_v29 }
 0x4f0   :  { %v1397_v47 = vadd.f32 %v1386_v58, %v1367_v41 }
 0x4f1   :  { %1450 = vperm.xlu0 %4675, %v1396_v33   ;;  %v3674_v33 = vunpack.c.l.bf16 %v5143_v29 }
 0x4f2   :  { %v1370_v35 = vpop.xlane.xlu1 %1369  ;;  %1425 = vperm.xlu1 %4676, %v1391_v34  }
 0x4f3   :  { %v1398_v37 = vadd.f32 %v1386_v58, %v1370_v35  ;;  %v1373_v45 = vpop.xlane.xlu0 %1372 }
 0x4f4   :  { %v1399_v49 = vadd.f32 %v1386_v58, %v1373_v45 }
 0x4f5   :  { %1460 = vperm.xlu0 %4675, %v1398_v37   ;;  %v5154_v37 = vld [vmem:[%s5694_s1 + $0x60] sm:$0xff]  }
 0x4f6   :  { %v1376_v51 = vpop.xlane.xlu1 %1375  ;;  %1440 = vperm.xlu1 %4676, %v1394_v38   ;;  %v3678_v41 = vunpack.c.l.bf16 %v5154_v37 }
 0x4f7   :  { %v1400_v3 = vadd.f32 %v1386_v58, %v1376_v51  ;;  %v1379_v50 = vpop.xlane.xlu0 %1378 }
 0x4f8   :  { %v1401_v52 = vadd.f32 %v1386_v58, %v1379_v50  ;;  %v5172_v50 = vld [vmem:[%s5694_s1 + $0x70] sm:$0xff]  }
 0x4f9   :  { %1470 = vperm.xlu0 %4675, %v1400_v3  }
 0x4fa   :  { %1435 = vperm.xlu1 %4676, %v1393_v39   ;;  %v1382_v42 = vpop.xlane.xlu1 %1381  ;;  %v3679_v39 = vunpack.c.h.bf16 %v5154_v37 }
 0x4fb   :  { %v1402_v43 = vadd.f32 %v1386_v58, %v1382_v42  ;;  %v5161_v42 = vld [vmem:[%s5694_s1 + $0x68] sm:$0xff]  }
 0x4fd   :  { %1480 = vperm.xlu0 %4675, %v1402_v43  }
 0x4fe   :  { %1445 = vperm.xlu1 %4676, %v1395_v44   ;;  %v3683_v44 = vunpack.c.h.bf16 %v5161_v42 }
 0x502   :  { %1455 = vperm.xlu1 %4676, %v1397_v47  }
 0x506   :  { %1465 = vperm.xlu1 %4676, %v1399_v49   ;;  %v3682_v49 = vunpack.c.l.bf16 %v5161_v42 }
 0x50a   :  { %1475 = vperm.xlu1 %4676, %v1401_v52  }
 0x55d   :  { %v1406_v57 = vpop.permute.xlu0 %1405 }
 0x55e   :  { %v1483_v59 = vmul.f32 %v3666_v55, %v1406_v57 }
 0x561   :  { %v1411_v58 = vpop.permute.xlu1 %1410 }
 0x562   :  { %v1484_v60 = vmul.f32 %v3667_v56, %v1411_v58 }
 0x564   :  { %v4516_v62 = vpack.c.bf16 %v1484_v60, %v1483_v59  ;;  %v3687_v60 = vunpack.c.h.bf16 %v5172_v50 }
 0x565   :  { %v1421_v63 = vpop.permute.xlu1 %1420 }
 0x566   :  { %4517 = vmatprep.subr.bf16.mxu0 %v4516_v62  ;;  %v1486_v27 = vmul.f32 %v3671_v48, %v1421_v63  ;;  %v3686_v63 = vunpack.c.l.bf16 %v5172_v50 }
 0x567   :  { %4519 = vmatpush3.bf16.msra.mxu0 %v4516_v62 }
 0x569   :  { %v1416_v1 = vpop.permute.xlu1 %1415 }
 0x56a   :  { %v1485_v28 = vmul.f32 %v3670_v0, %v1416_v1  ;;  %v5183_v1 = vld [vmem:[%s5694_s1 + $0x78] sm:$0xff]  }
 0x56c   :  { %v4520_v30 = vpack.c.bf16 %v1486_v27, %v1485_v28 }
 0x56d   :  { %v1431_v31 = vpop.permute.xlu1 %1430 }
 0x56e   :  { %4521 = vmatprep.subr.bf16.mxu0 %v4520_v30  ;;  %v1488_v35 = vmul.f32 %v3675_v32, %v1431_v31 }
 0x56f   :  { %4523 = vmatpush3.bf16.msra.mxu0 %v4520_v30 }
 0x570   :  { %v1451_v51 = vpop.permute.xlu0 %1450 }
 0x571   :  { %v1426_v34 = vpop.permute.xlu1 %1425  ;;  %v1492_v59 = vmul.f32 %v3683_v44, %v1451_v51 }
 0x572   :  { %v1487_v36 = vmul.f32 %v3674_v33, %v1426_v34  ;;  %v5700_v34 = vunpack.c.h.bf16 %v5183_v1 }
 0x574   :  { %v4524_v38 = vpack.c.bf16 %v1488_v35, %v1487_v36  ;;  %v1461_v52 = vpop.permute.xlu0 %1460  ;;  %v3690_v36 = vunpack.c.l.bf16 %v5183_v1 }
 0x575   :  { %v1441_v3 = vpop.permute.xlu1 %1440  ;;  %v1494_v31 = vmul.f32 %v3687_v60, %v1461_v52 }
 0x576   :  { %4525 = vmatprep.subr.bf16.mxu0 %v4524_v38  ;;  %v1490_v45 = vmul.f32 %v3679_v39, %v1441_v3 }
 0x577   :  { %4527 = vmatpush3.bf16.msra.mxu0 %v4524_v38  ;;  %v5194_v38 = vld [vmem:[%s5694_s1 + $0x80] sm:$0xff]  }
 0x578   :  { %v1471_v28 = vpop.permute.xlu0 %1470  ;;  %v5699_v52 = vunpack.c.l.bf16 %v5194_v38 }
 0x579   :  { %v1436_v43 = vpop.permute.xlu1 %1435 }
 0x57a   :  { %v1489_v47 = vmul.f32 %v3678_v41, %v1436_v43  ;;  %v1496_v43 = vmul.f32 %v5700_v34, %v1471_v28 }
 0x57c   :  { %v4528_v57 = vpack.c.bf16 %v1490_v45, %v1489_v47  ;;  %v5698_v45 = vunpack.c.h.bf16 %v5194_v38 }
 0x57d   :  { %v1446_v58 = vpop.permute.xlu1 %1445 }
 0x57e   :  { %v1491_v62 = vmul.f32 %v3682_v49, %v1446_v58  ;;  %4529 = vmatprep.subr.bf16.mxu0 %v4528_v57 }
 0x57f   :  { %4531 = vmatpush3.bf16.msra.mxu0 %v4528_v57  ;;  %v1481_v57 = vpop.permute.xlu0 %1480 }
 0x580   :  { %v4532_v27 = vpack.c.bf16 %v1492_v59, %v1491_v62  ;;  %v1498_v62 = vmul.f32 %v5698_v45, %v1481_v57 }
 0x581   :  { %v1456_v30 = vpop.permute.xlu1 %1455 }
 0x582   :  { %v1493_v35 = vmul.f32 %v3686_v63, %v1456_v30  ;;  %4533 = vmatprep.subr.bf16.mxu0 %v4532_v27  ;;  %v5697_v30 = vunpack.c.h.bf16 %v5113_v40 }
 0x583   :  { %4535 = vmatpush3.bf16.msra.mxu0 %v4532_v27 }
 0x584   :  { %v4536_v51 = vpack.c.bf16 %v1494_v31, %v1493_v35  ;;  %v83_v31 = vld [vmem:[%s5695_s2 + $0x8] sm:$0xff]  ;;  %v82_v35 = vld [vmem:[%s5695_s2] sm:$0xff] }
 0x585   :  { %v1466_v3 = vpop.permute.xlu1 %1465 }
 0x586   :  { %v1495_v47 = vmul.f32 %v3690_v36, %v1466_v3  ;;  %4537 = vmatprep.subr.bf16.mxu0 %v4536_v51 }
 0x587   :  { %4539 = vmatpush3.bf16.msra.mxu0 %v4536_v51 }
 0x588   :  { %v4540_v58 = vpack.c.bf16 %v1496_v43, %v1495_v47 }
 0x589   :  { %v1476_v59 = vpop.permute.xlu1 %1475 }
 0x58a   :  { %v1497_v27 = vmul.f32 %v5699_v52, %v1476_v59  ;;  %4541 = vmatprep.subr.bf16.mxu0 %v4540_v58 }
 0x58b   :  { %4543 = vmatpush3.bf16.msra.mxu0 %v4540_v58 }
 0x58c   :  { %v4544_v28 = vpack.c.bf16 %v1498_v62, %v1497_v27 }
 0x58e   :  { %4545 = vmatprep.subr.bf16.mxu0 %v4544_v28 }
 0x58f   :  { %4547 = vmatpush3.bf16.msra.mxu0 %v4544_v28 }
 0x592   :  { %4199 = vmatmul.mubr.f32.vlgmr.msra.gmra.mrb[48].mxu0 %v5697_v30 }
 0x665   :  { %v4200_v51 = vpop.f32.mrb[48].mxu0 }
 0x666   :  { %v1575_v3 = vsub.f32 %v4200_v51, %v83_v31  ;;  %v1565_v43 = vpop.f32.mrb[49].mxu0 }
 0x667   :  { %v1574_v47 = vsub.f32 %v1565_v43, %v82_v35 }
 0x668   :  { %v1579_v57 = vsel %vm123_vm0, %v1575_v3, -inf }
 0x669   :  { %1580 = vmax.xlane.f32.xlu0 %v1579_v57  ;;  %v1576_v58 = vsel %vm123_vm0, %v1574_v47, -inf }
 0x66a   :  { %1577 = vmax.xlane.f32.xlu1 %v1576_v58 }
 0x6f6   :  { %v1581_v59 = vpop.xlane.xlu0 %1580 }
 0x6f7   :  { %v1583_v62 = vsub.f32 %v1575_v3, %v1581_v59  ;;  %v1578_v27 = vpop.xlane.xlu1 %1577  ;;  %v121_v59 = vld [vmem:[%s5695_s2 + $0x100] sm:$0xff] }
 0x6f8   :  { %v1582_v28 = vsub.f32 %v1574_v47, %v1578_v27 }
 0x6f9   :  { %v1586_v30 = vmul.f32 1.442695, %v1583_v62 }
 0x6fa   :  { %v1584_v45 = vmul.f32 1.442695, %v1582_v28 }
 0x6fb   :  { %4677 = vpow2.f32 %v1586_v30  ;;  %v119_v30 = vld [vmem:[%s5695_s2 + $0xf0] sm:$0xff] }
 0x6fc   :  { %4679 = vpow2.f32 %v1584_v45  ;;  %v118_v45 = vld [vmem:[%s5695_s2 + $0xe8] sm:$0xff] }
 0x705   :  { %v4678_v52 = vpop.eup %4677 }
 0x706   :  { %v4680_v34 = vpop.eup %4679  ;;  %v1591_v31 = vsel %vm123_vm0, %v4678_v52, 0.0 }
 0x707   :  { %1592 = vadd.xlane.f32.xlu1 %v1591_v31  ;;  %v1588_v35 = vsel %vm123_vm0, %v4680_v34, 0.0 }
 0x708   :  { %1589 = vadd.xlane.f32.xlu0 %v1588_v35 }
 0x794   :  { %v1593_v51 = vpop.xlane.xlu1 %1592 }
 0x795   :  { %4681 = vrcp.f32 %v1593_v51  ;;  %v1590_v43 = vpop.xlane.xlu0 %1589  ;;  %v4693_v51 = vld [vmem:[%s5693_s0] sm:$0xff] }
 0x796   :  { %4683 = vrcp.f32 %v1590_v43 }
 0x79f   :  { %v4682_v57 = vpop.eup %4681 }
 0x7a0   :  { %v4684_v3 = vpop.eup %4683  ;;  %v5221_v47 = vmul.f32 %v4682_v57, %v4678_v52  ;;  %v4552_v52 = vpack.c.bf16 %v119_v30, %v118_v45  ;;  %v4694_v57 = vld [vmem:[%s5693_s0 + $0x8] sm:$0xff]  ;;  %v122_v45 = vld [vmem:[%s5695_s2 + $0x130] sm:$0xff] }
 0x7a1   :  { %v5219_v58 = vmul.f32 %v4684_v3, %v4680_v34  ;;  %v120_v34 = vld [vmem:[%s5695_s2 + $0xf8] sm:$0xff]  ;;  %v1692_v30 = vrot.slane %v122_v45, %v4898_v46 }
 0x7a2   :  { %v4556_v62 = vpack.c.bf16 %v121_v59, %v120_v34  ;;  %4553 = vmatprep.subr.bf16.mxu1 %v4552_v52 }
 0x7a3   :  { %4205 = vmatprep.mubr.msk.f32.mxu1 %vm123_vm0, %v5219_v58 }
 0x7a4   :  { %4206 = vmatmul.mubr.msk.f32.vlgmr.msra.gmra.mrb[32].mxu1 %vm123_vm0, %v5221_v47 }
 0x7a5   :  { %4555 = vmatpush3.bf16.msra.mxu1 %v4552_v52 }
 0x7a6   :  { %4557 = vmatprep.subr.bf16.mxu1 %v4556_v62 }
 0x7a9   :  { %4559 = vmatpush3.bf16.msra.mxu1 %v4556_v62 }
 0x877   :  { %v4207_v27 = vpop.f32.mrb[32].mxu1 }
 0x878   :  { %1683 = vrot.lane.b32.xlu1 %v4207_v27, %s4698_s17  ;;  %v1670_v28 = vpop.f32.mrb[33].mxu1 }
 0x879   :  { %1681 = vrot.lane.b32.xlu0 %v1670_v28, %s4698_s17 }
 0x8ea   :  { %v1684_v31 = vpop.permute.xlu1 %1683 }
 0x8eb   :  { %v1682_v35 = vpop.permute.xlu0 %1681  ;;  %v1688_v3 = vsel %vm123_vm0, %v4694_v57, %v1684_v31 }
 0x8ec   :  { %v1687_v43 = vsel %vm123_vm0, %v4693_v51, %v1682_v35 }
 0x8ed   :  { %4216 = vmatprep.mubr.msk.f32.mxu1 %vm1334_vm10, %v1687_v43  ;;  %v1791_v43 = vld [vmem:[%s5695_s2 + $0x140] sm:$0xff] }
 0x8ee   :  { %4217 = vmatmul.mubr.msk.f32.vlgmr.msra.gmra.mrb[34].mxu1 %vm1334_vm10, %v1688_v3 }
 0x8ef   :  { %4223 = vmatprep.mubr.msk.f32.mxu1 %vm123_vm0, %v3630_v4  ;;  %v1790_v4 = vld [vmem:[%s5695_s2 + $0x138] sm:$0xff] }
 0x8f0   :  { %v4564_v3 = vpack.c.bf16 %v1791_v43, %v1790_v4 }
 0x8f2   :  { %4565 = vmatprep.subr.bf16.mxu0 %v4564_v3 }
 0x8f3   :  { %4567 = vmatpush3.bf16.msra.mxu0 %v4564_v3 }
 0x9c1   :  { %v4218_v34 = vpop.f32.mrb[34].mxu1 }
 0x9c2   :  { %v1771_v52 = vadd.f32 %v4218_v34, %v1692_v30  ;;  %v1765_v59 = vpop.f32.mrb[35].mxu1 }
 0x9c3   :  { %v1766_v62 = vadd.f32 %v1765_v59, %v1692_v30 }
 0x9c4   :  { %v1777_v27 = vmul.f32 0.01, %v1771_v52  ;;  %vm1775_vm12 = vcmp.ge.f32.partialorder %v1771_v52, 0.0 }
 0x9c5   :  { %v1776_v28 = vmul.f32 0.01, %v1766_v62  ;;  %vm1774_vm13 = vcmp.ge.f32.partialorder %v1766_v62, 0.0 }
 0x9c6   :  { %v1779_v31 = vsel %vm1775_vm12, %v1771_v52, %v1777_v27 }
 0x9c7   :  { %1784 = vrot.lane.b32.xlu0 %v1779_v31, %s4698_s17  ;;  %v1778_v35 = vsel %vm1774_vm13, %v1766_v62, %v1776_v28 }
 0x9c8   :  { %1782 = vrot.lane.b32.xlu1 %v1778_v35, %s4698_s17 }
 0xa39   :  { %v1785_v45 = vpop.permute.xlu0 %1784 }
 0xa3a   :  { %v5267_v30 = vsel %vm123_vm0, %v4694_v57, %v1785_v45  ;;  %v1783_v34 = vpop.permute.xlu1 %1782 }
 0xa3b   :  { %v5270_v52 = vsel %vm123_vm0, %v4693_v51, %v1783_v34 }
 0xa3c   :  { %v5274_v59 = vpack.c.bf16 %v5267_v30, %v5270_v52 }
 0xa3e   :  { %4561 = vmatprep.subr.bf16.mxu1 %v5274_v59 }
 0xa3f   :  { %4563 = vmatpush3.bf16.msra.mxu1 %v5274_v59 }
 0xa42   :  { %4224 = vmatmul.mubr.msk.f32.vlgmr.msra.gmra.mrb[36].mxu1 %vm123_vm0, %v3631_v6  ;;  %v4568_v6 = vpack.c.bf16 %v1793_v5, %v1792_v2 }
 0xa43   :  { %4226 = vmatprep.mubr.msk.f32.mxu1 %vm123_vm0, %v3634_v7  ;;  %v1795_v7 = vld [vmem:[%s5695_s2 + $0x158] sm:$0xff] }
 0xa44   :  { %4569 = vmatprep.subr.bf16.mxu0 %v4568_v6 }
 0xa45   :  { %4571 = vmatpush3.bf16.msra.mxu0 %v4568_v6 }
 0xa46   :  { %4227 = vmatmul.mubr.msk.f32.gmra.mrb[38].mxu1 %vm123_vm0, %v3635_v9  ;;  %v1797_v9 = vld [vmem:[%s5695_s2 + $0x168] sm:$0xff] }
 0xa47   :  { %4229 = vmatprep.mubr.msk.f32.mxu1 %vm123_vm0, %v3638_v10  ;;  %v4572_v10 = vpack.c.bf16 %v1796_v8, %v1795_v7 }
 0xa49   :  { %4573 = vmatprep.subr.bf16.mxu1 %v4572_v10 }
 0xa4a   :  { %4230 = vmatmul.mubr.msk.f32.gmra.mrb[40].mxu1 %vm123_vm0, %v3639_v12  ;;  %v4576_v12 = vpack.c.bf16 %v1798_v11, %v1797_v9 }
 0xa4b   :  { %4232 = vmatprep.mubr.msk.f32.mxu1 %vm123_vm0, %v3642_v13  ;;  %v1799_v13 = vld [vmem:[%s5695_s2 + $0x178] sm:$0xff]  ;;  %4575 = vmatpush3.bf16.msra.mxu1 %v4572_v10 }
 0xa4c   :  { %4577 = vmatprep.subr.bf16.mxu1 %v4576_v12 }
 0xa4e   :  { %4233 = vmatmul.mubr.msk.f32.gmra.mrb[42].mxu1 %vm123_vm0, %v3643_v15  ;;  %v4580_v15 = vpack.c.bf16 %v1800_v14, %v1799_v13  ;;  %v1801_v13 = vld [vmem:[%s5695_s2 + $0x188] sm:$0xff]  ;;  %v1802_v14 = vld [vmem:[%s5695_s2 + $0x190] sm:$0xff] }
 0xa4f   :  { %4235 = vmatprep.mubr.msk.f32.mxu1 %vm123_vm0, %v3646_v16  ;;  %4579 = vmatpush3.bf16.msra.mxu1 %v4576_v12 }
 0xa50   :  { %4581 = vmatprep.subr.bf16.mxu1 %v4580_v15 }
 0xa52   :  { %4236 = vmatmul.mubr.msk.f32.gmra.mrb[44].mxu1 %vm123_vm0, %v3647_v18 }
 0xa53   :  { %4238 = vmatprep.mubr.msk.f32.mxu1 %vm123_vm0, %v3650_v19  ;;  %4583 = vmatpush3.bf16.msra.mxu1 %v4580_v15  ;;  %v4584_v15 = vpack.c.bf16 %v1802_v14, %v1801_v13 }
 0xa55   :  { %4585 = vmatprep.subr.bf16.mxu1 %v4584_v15 }
 0xa56   :  { %4239 = vmatmul.mubr.msk.f32.gmra.mrb[46].mxu1 %vm123_vm0, %v3651_v21 }
 0xa57   :  { %4241 = vmatprep.mubr.msk.f32.mxu1 %vm123_vm0, %v3654_v22  ;;  %4587 = vmatpush3.bf16.msra.mxu1 %v4584_v15 }
 0xa5a   :  { %4242 = vmatmul.mubr.msk.f32.gmra.mrb[48].mxu1 %vm123_vm0, %v3655_v24 }
 0xa5b   :  { %4244 = vmatprep.mubr.msk.f32.mxu1 %vm123_vm0, %v3658_v25 }
 0xa5e   :  { %4245 = vmatmul.mubr.msk.f32.gmra.mrb[50].mxu1 %vm123_vm0, %v3659_v26 }
 0xb15   :  { %v4225_v16 = vpop.f32.mrb[36].mxu1 }
 0xb16   :  { %v1899_v17 = vpop.f32.mrb[37].mxu1  ;;  %v1979_v19 = vand.u32 2147483647, %v4225_v16  ;;  %v1804_v16 = vld [vmem:[%s5695_s2 + $0x198] sm:$0xff] }
 0xb17   :  { %v1978_v18 = vand.u32 2147483647, %v1899_v17  ;;  %v1805_v17 = vld [vmem:[%s5695_s2 + $0x1a0] sm:$0xff] }
 0xb19   :  { %v4228_v20 = vpop.f32.mrb[38].mxu1  ;;  %4255 = vmatprep.mubr.msk.f32.mxu0 %vm1334_vm10, %v1978_v18  ;;  %v1806_v18 = vld [vmem:[%s5695_s2 + $0x1a8] sm:$0xff] }
 0xb1a   :  { %v1909_v21 = vpop.f32.mrb[39].mxu1  ;;  %4256 = vmatmul.mubr.msk.f32.vlgmr.msra.gmra.mrb[50].mxu0 %vm1334_vm10, %v1979_v19  ;;  %v1981_v23 = vand.u32 2147483647, %v4228_v20  ;;  %v4588_v19 = vpack.c.bf16 %v1805_v17, %v1804_v16  ;;  %v1807_v20 = vld [vmem:[%s5695_s2 + $0x1b0] sm:$0xff] }
 0xb1b   :  { %v1980_v22 = vand.u32 2147483647, %v1909_v21  ;;  %v4592_v21 = vpack.c.bf16 %v1807_v20, %v1806_v18 }
 0xb1c   :  { %4589 = vmatprep.subr.bf16.mxu0 %v4588_v19 }
 0xb1d   :  { %v4231_v24 = vpop.f32.mrb[40].mxu1  ;;  %4258 = vmatprep.mubr.msk.f32.mxu0 %vm1334_vm10, %v1980_v22  ;;  %v1808_v22 = vld [vmem:[%s5695_s2 + $0x1b8] sm:$0xff]  ;;  %4591 = vmatpush3.bf16.msra.mxu0 %v4588_v19 }
 0xb1e   :  { %v1919_v25 = vpop.f32.mrb[41].mxu1  ;;  %4259 = vmatmul.mubr.msk.f32.gmra.mrb[52].mxu0 %vm1334_vm10, %v1981_v23  ;;  %v1983_v51 = vand.u32 2147483647, %v4231_v24  ;;  %v1809_v23 = vld [vmem:[%s5695_s2 + $0x1c0] sm:$0xff]  ;;  %4593 = vmatprep.subr.bf16.mxu0 %v4592_v21 }
 0xb1f   :  { %v1982_v26 = vand.u32 2147483647, %v1919_v25  ;;  %v4596_v24 = vpack.c.bf16 %v1809_v23, %v1808_v22  ;;  %v1794_v25 = vld [vmem:[%s5695_s2 + $0x260] sm:$0xff] }
 0xb21   :  { %v4234_v57 = vpop.f32.mrb[42].mxu1  ;;  %4261 = vmatprep.mubr.msk.f32.mxu0 %vm1334_vm10, %v1982_v26  ;;  %4595 = vmatpush3.bf16.msra.mxu0 %v4592_v21  ;;  %v5391_v26 = vrot.slane %v1794_v25, %v4898_v46 }
 0xb22   :  { %v1929_v62 = vpop.f32.mrb[43].mxu1  ;;  %4262 = vmatmul.mubr.msk.f32.gmra.mrb[54].mxu0 %vm1334_vm10, %v1983_v51  ;;  %v1985_v28 = vand.u32 2147483647, %v4234_v57  ;;  %4597 = vmatprep.subr.bf16.mxu0 %v4596_v24 }
 0xb23   :  { %v1984_v27 = vand.u32 2147483647, %v1929_v62 }
 0xb25   :  { %v4237_v31 = vpop.f32.mrb[44].mxu1  ;;  %4264 = vmatprep.mubr.msk.f32.mxu0 %vm1334_vm10, %v1984_v27  ;;  %4599 = vmatpush3.bf16.msra.mxu0 %v4596_v24 }
 0xb26   :  { %v1939_v35 = vpop.f32.mrb[45].mxu1  ;;  %4265 = vmatmul.mubr.msk.f32.gmra.mrb[56].mxu0 %vm1334_vm10, %v1985_v28  ;;  %v1987_v43 = vand.u32 2147483647, %v4237_v31 }
 0xb27   :  { %v1986_v4 = vand.u32 2147483647, %v1939_v35 }
 0xb29   :  { %v4240_v3 = vpop.f32.mrb[46].mxu1  ;;  %4267 = vmatprep.mubr.msk.f32.mxu0 %vm1334_vm10, %v1986_v4 }
 0xb2a   :  { %v1949_v45 = vpop.f32.mrb[47].mxu1  ;;  %4268 = vmatmul.mubr.msk.f32.gmra.mrb[58].mxu0 %vm1334_vm10, %v1987_v43  ;;  %v1989_v2 = vand.u32 2147483647, %v4240_v3 }
 0xb2b   :  { %v1988_v34 = vand.u32 2147483647, %v1949_v45 }
 0xb2d   :  { %v4243_v5 = vpop.f32.mrb[48].mxu1  ;;  %4270 = vmatprep.mubr.msk.f32.mxu0 %vm1334_vm10, %v1988_v34 }
 0xb2e   :  { %v1959_v6 = vpop.f32.mrb[49].mxu1  ;;  %4271 = vmatmul.mubr.msk.f32.gmra.mrb[60].mxu0 %vm1334_vm10, %v1989_v2  ;;  %v1991_v8 = vand.u32 2147483647, %v4243_v5 }
 0xb2f   :  { %v1990_v7 = vand.u32 2147483647, %v1959_v6 }
 0xb31   :  { %v4246_v9 = vpop.f32.mrb[50].mxu1  ;;  %4273 = vmatprep.mubr.msk.f32.mxu0 %vm1334_vm10, %v1990_v7 }
 0xb32   :  { %v1969_v10 = vpop.f32.mrb[51].mxu1  ;;  %4274 = vmatmul.mubr.msk.f32.gmra.mrb[62].mxu0 %vm1334_vm10, %v1991_v8  ;;  %v1993_v12 = vand.u32 2147483647, %v4246_v9 }
 0xb33   :  { %v1992_v11 = vand.u32 2147483647, %v1969_v10 }
 0xb35   :  { %4276 = vmatprep.mubr.msk.f32.mxu0 %vm1334_vm10, %v1992_v11 }
 0xb36   :  { %4277 = vmatmul.mubr.msk.f32.gmra.mrb[64].mxu0 %vm1334_vm10, %v1993_v12 }
 0xbed   :  { %v4257_v51 = vpop.f32.mrb[50].mxu0 }
 0xbee   :  { %v2118_v57 = vadd.f32 %v4257_v51, %v5391_v26  ;;  %v2112_v62 = vpop.f32.mrb[51].mxu0 }
 0xbef   :  { %v2113_v27 = vadd.f32 %v2112_v62, %v5391_v26 }
 0xbf0   :  { %v2208_v28 = vmul.f32 0.01, %v2118_v57  ;;  %vm2192_vm14 = vcmp.ge.f32.partialorder %v2118_v57, 0.0 }
 0xbf1   :  { %vm2191_vm15 = vcmp.ge.f32.partialorder %v2113_v27, 0.0  ;;  %v2207_v31 = vmul.f32 0.01, %v2113_v27  ;;  %v4260_v35 = vpop.f32.mrb[52].mxu0 }
 0xbf2   :  { %v2128_v4 = vadd.f32 %v4260_v35, %v5391_v26  ;;  %v2122_v43 = vpop.f32.mrb[53].mxu0  ;;  %v2224_v34 = vsel %vm2192_vm14, %v2118_v57, %v2208_v28 }
 0xbf3   :  { %v2123_v3 = vadd.f32 %v2122_v43, %v5391_v26  ;;  %v2223_v45 = vsel %vm2191_vm15, %v2113_v27, %v2207_v31 }
 0xbf4   :  { %v2210_v2 = vmul.f32 0.01, %v2128_v4  ;;  %4295 = vmatprep.mubr.msk.f32.mxu1 %vm582_vm3, %v2223_v45  ;;  %vm2194_vm1 = vcmp.ge.f32.partialorder %v2128_v4, 0.0 }
 0xbf5   :  { %vm2193_vm2 = vcmp.ge.f32.partialorder %v2123_v3, 0.0  ;;  %v2209_v5 = vmul.f32 0.01, %v2123_v3  ;;  %v4263_v6 = vpop.f32.mrb[54].mxu0  ;;  %4296 = vmatmul.mubr.msk.f32.vlgmr.msra.gmra.mrb[52].mxu1 %vm582_vm3, %v2224_v34 }
 0xbf6   :  { %v2138_v7 = vadd.f32 %v4263_v6, %v5391_v26  ;;  %v2132_v8 = vpop.f32.mrb[55].mxu0  ;;  %v2226_v12 = vsel %vm2194_vm1, %v2128_v4, %v2210_v2 }
 0xbf7   :  { %v2133_v9 = vadd.f32 %v2132_v8, %v5391_v26  ;;  %v2225_v10 = vsel %vm2193_vm2, %v2123_v3, %v2209_v5 }
 0xbf8   :  { %v2212_v11 = vmul.f32 0.01, %v2138_v7  ;;  %4298 = vmatprep.mubr.msk.f32.mxu1 %vm582_vm3, %v2225_v10  ;;  %vm2196_vm4 = vcmp.ge.f32.partialorder %v2138_v7, 0.0 }
 0xbf9   :  { %vm2195_vm5 = vcmp.ge.f32.partialorder %v2133_v9, 0.0  ;;  %v2211_v13 = vmul.f32 0.01, %v2133_v9  ;;  %v4266_v14 = vpop.f32.mrb[56].mxu0  ;;  %4299 = vmatmul.mubr.msk.f32.gmra.mrb[54].mxu1 %vm582_vm3, %v2226_v12 }
 0xbfa   :  { %v2148_v15 = vadd.f32 %v4266_v14, %v5391_v26  ;;  %v2142_v16 = vpop.f32.mrb[57].mxu0  ;;  %v2228_v20 = vsel %vm2196_vm4, %v2138_v7, %v2212_v11 }
 0xbfb   :  { %v2143_v17 = vadd.f32 %v2142_v16, %v5391_v26  ;;  %v2227_v18 = vsel %vm2195_vm5, %v2133_v9, %v2211_v13 }
 0xbfc   :  { %v2214_v19 = vmul.f32 0.01, %v2148_v15  ;;  %4301 = vmatprep.mubr.msk.f32.mxu1 %vm582_vm3, %v2227_v18  ;;  %vm2198_vm6 = vcmp.ge.f32.partialorder %v2148_v15, 0.0 }
 0xbfd   :  { %vm2197_vm7 = vcmp.ge.f32.partialorder %v2143_v17, 0.0  ;;  %v2213_v21 = vmul.f32 0.01, %v2143_v17  ;;  %v4269_v22 = vpop.f32.mrb[58].mxu0  ;;  %4302 = vmatmul.mubr.msk.f32.gmra.mrb[56].mxu1 %vm582_vm3, %v2228_v20 }
 0xbfe   :  { %v2158_v23 = vadd.f32 %v4269_v22, %v5391_v26  ;;  %v2152_v24 = vpop.f32.mrb[59].mxu0  ;;  %v2230_v62 = vsel %vm2198_vm6, %v2148_v15, %v2214_v19  ;;  %v1811_v22 = vld [vmem:[%s5695_s2 + $0x1d0] sm:$0xff] }
 0xbff   :  { %v2153_v25 = vadd.f32 %v2152_v24, %v5391_v26  ;;  %v2229_v51 = vsel %vm2197_vm7, %v2143_v17, %v2213_v21  ;;  %v1813_v24 = vld [vmem:[%s5695_s2 + $0x1d8] sm:$0xff] }
 0xc00   :  { %v2216_v57 = vmul.f32 0.01, %v2158_v23  ;;  %4304 = vmatprep.mubr.msk.f32.mxu1 %vm582_vm3, %v2229_v51  ;;  %vm2200_vm8 = vcmp.ge.f32.partialorder %v2158_v23, 0.0  ;;  %v1815_v51 = vld [vmem:[%s5695_s2 + $0x1e8] sm:$0xff] }
 0xc01   :  { %vm2199_vm9 = vcmp.ge.f32.partialorder %v2153_v25, 0.0  ;;  %v2215_v27 = vmul.f32 0.01, %v2153_v25  ;;  %v4272_v28 = vpop.f32.mrb[60].mxu0  ;;  %4305 = vmatmul.mubr.msk.f32.gmra.mrb[58].mxu1 %vm582_vm3, %v2230_v62  ;;  %v1816_v62 = vld [vmem:[%s5695_s2 + $0x1f0] sm:$0xff] }
 0xc02   :  { %v2168_v31 = vadd.f32 %v4272_v28, %v5391_v26  ;;  %v2162_v35 = vpop.f32.mrb[61].mxu0  ;;  %v2232_v45 = vsel %vm2200_vm8, %v2158_v23, %v2216_v57  ;;  %v1817_v28 = vld [vmem:[%s5695_s2 + $0x1f8] sm:$0xff] }
 0xc03   :  { %v2163_v4 = vadd.f32 %v2162_v35, %v5391_v26  ;;  %v2231_v43 = vsel %vm2199_vm9, %v2153_v25, %v2215_v27  ;;  %v1814_v25 = vld [vmem:[%s5695_s2 + $0x1e0] sm:$0xff]  ;;  %v4608_v27 = vpack.c.bf16 %v1816_v62, %v1815_v51 }
 0xc04   :  { %v2218_v3 = vmul.f32 0.01, %v2168_v31  ;;  %4307 = vmatprep.mubr.msk.f32.mxu1 %vm582_vm3, %v2231_v43  ;;  %vm2202_vm11 = vcmp.ge.f32.partialorder %v2168_v31, 0.0  ;;  %v4604_v57 = vpack.c.bf16 %v1814_v25, %v1813_v24 }
 0xc05   :  { %vm2201_vm12 = vcmp.ge.f32.partialorder %v2163_v4, 0.0  ;;  %v2217_v34 = vmul.f32 0.01, %v2163_v4  ;;  %v4275_v2 = vpop.f32.mrb[62].mxu0  ;;  %4308 = vmatmul.mubr.msk.f32.gmra.mrb[60].mxu1 %vm582_vm3, %v2232_v45 }
 0xc06   :  { %v2178_v5 = vadd.f32 %v4275_v2, %v5391_v26  ;;  %v2172_v6 = vpop.f32.mrb[63].mxu0  ;;  %v2234_v10 = vsel %vm2202_vm11, %v2168_v31, %v2218_v3  ;;  %v1818_v31 = vld [vmem:[%s5695_s2 + $0x200] sm:$0xff]  ;;  %4605 = vmatprep.subr.bf16.mxu1 %v4604_v57 }
 0xc07   :  { %v2173_v7 = vadd.f32 %v2172_v6, %v5391_v26  ;;  %v2233_v8 = vsel %vm2201_vm12, %v2163_v4, %v2217_v34  ;;  %4607 = vmatpush3.bf16.msra.mxu1 %v4604_v57  ;;  %v4612_v35 = vpack.c.bf16 %v1818_v31, %v1817_v28  ;;  %v1803_v4 = vld [vmem:[%s5695_s2 + $0x268] sm:$0xff] }
 0xc08   :  { %v2220_v9 = vmul.f32 0.01, %v2178_v5  ;;  %4310 = vmatprep.mubr.msk.f32.mxu1 %vm582_vm3, %v2233_v8  ;;  %vm2204_vm13 = vcmp.ge.f32.partialorder %v2178_v5, 0.0  ;;  %4609 = vmatprep.subr.bf16.mxu1 %v4608_v27  ;;  %v5453_v43 = vrot.slane %v1803_v4, %v4898_v46 }
 0xc09   :  { %vm2203_vm14 = vcmp.ge.f32.partialorder %v2173_v7, 0.0  ;;  %v2219_v11 = vmul.f32 0.01, %v2173_v7  ;;  %v4278_v12 = vpop.f32.mrb[64].mxu0  ;;  %4311 = vmatmul.mubr.msk.f32.gmra.mrb[62].mxu1 %vm582_vm3, %v2234_v10 }
 0xc0a   :  { %v2188_v13 = vadd.f32 %v4278_v12, %v5391_v26  ;;  %v2182_v14 = vpop.f32.mrb[65].mxu0  ;;  %v2236_v18 = vsel %vm2204_vm13, %v2178_v5, %v2220_v9 }
 0xc0b   :  { %v2183_v15 = vadd.f32 %v2182_v14, %v5391_v26  ;;  %v2235_v16 = vsel %vm2203_vm14, %v2173_v7, %v2219_v11  ;;  %v1810_v26 = vld [vmem:[%s5695_s2 + $0x1c8] sm:$0xff]  ;;  %4611 = vmatpush3.bf16.msra.mxu1 %v4608_v27 }
 0xc0c   :  { %v2222_v17 = vmul.f32 0.01, %v2188_v13  ;;  %4313 = vmatprep.mubr.msk.f32.mxu1 %vm582_vm3, %v2235_v16  ;;  %vm2206_vm15 = vcmp.ge.f32.partialorder %v2188_v13, 0.0  ;;  %v4600_v23 = vpack.c.bf16 %v1811_v22, %v1810_v26  ;;  %4613 = vmatprep.subr.bf16.mxu1 %v4612_v35 }
 0xc0d   :  { %vm2205_vm1 = vcmp.ge.f32.partialorder %v2183_v15, 0.0  ;;  %v2221_v19 = vmul.f32 0.01, %v2183_v15  ;;  %4314 = vmatmul.mubr.msk.f32.gmra.mrb[64].mxu1 %vm582_vm3, %v2236_v18 }
 0xc0e   :  { %v2238_v21 = vsel %vm2206_vm15, %v2188_v13, %v2222_v17  ;;  %4601 = vmatprep.subr.bf16.mxu0 %v4600_v23 }
 0xc0f   :  { %v2237_v20 = vsel %vm2205_vm1, %v2183_v15, %v2221_v19  ;;  %4603 = vmatpush3.bf16.msra.mxu0 %v4600_v23  ;;  %4615 = vmatpush3.bf16.msra.mxu1 %v4612_v35 }
 0xc10   :  { %4316 = vmatprep.mubr.msk.f32.mxu1 %vm582_vm3, %v2237_v20 }
 0xc11   :  { %4317 = vmatmul.mubr.msk.f32.gmra.mrb[66].mxu1 %vm582_vm3, %v2238_v21 }
 0xcc8   :  { %v4297_v3 = vpop.f32.mrb[52].mxu1 }
 0xcc9   :  { %v2363_v45 = vadd.f32 %v4297_v3, %v5453_v43  ;;  %v2357_v34 = vpop.f32.mrb[53].mxu1 }
 0xcca   :  { %v2358_v2 = vadd.f32 %v2357_v34, %v5453_v43 }
 0xccb   :  { %v2453_v5 = vmul.f32 0.01, %v2363_v45  ;;  %vm2437_vm2 = vcmp.ge.f32.partialorder %v2363_v45, 0.0 }
 0xccc   :  { %vm2436_vm4 = vcmp.ge.f32.partialorder %v2358_v2, 0.0  ;;  %v2452_v6 = vmul.f32 0.01, %v2358_v2  ;;  %v4300_v7 = vpop.f32.mrb[54].mxu1 }
 0xccd   :  { %v2373_v8 = vadd.f32 %v4300_v7, %v5453_v43  ;;  %v2367_v9 = vpop.f32.mrb[55].mxu1  ;;  %v2469_v12 = vsel %vm2437_vm2, %v2363_v45, %v2453_v5 }
 0xcce   :  { %v2368_v10 = vadd.f32 %v2367_v9, %v5453_v43  ;;  %v2468_v11 = vsel %vm2436_vm4, %v2358_v2, %v2452_v6 }
 0xccf   :  { %v2455_v13 = vmul.f32 0.01, %v2373_v8  ;;  %4335 = vmatprep.mubr.msk.f32.mxu0 %vm582_vm3, %v2468_v11  ;;  %vm2439_vm5 = vcmp.ge.f32.partialorder %v2373_v8, 0.0 }
 0xcd0   :  { %vm2438_vm6 = vcmp.ge.f32.partialorder %v2368_v10, 0.0  ;;  %v2454_v14 = vmul.f32 0.01, %v2368_v10  ;;  %v4303_v15 = vpop.f32.mrb[56].mxu1  ;;  %4336 = vmatmul.mubr.msk.f32.vlgmr.msra.gmra.mrb[66].mxu0 %vm582_vm3, %v2469_v12 }
 0xcd1   :  { %v2383_v16 = vadd.f32 %v4303_v15, %v5453_v43  ;;  %v2377_v17 = vpop.f32.mrb[57].mxu1  ;;  %v2471_v21 = vsel %vm2439_vm5, %v2373_v8, %v2455_v13 }
 0xcd2   :  { %v2378_v18 = vadd.f32 %v2377_v17, %v5453_v43  ;;  %v2470_v19 = vsel %vm2438_vm6, %v2368_v10, %v2454_v14 }
 0xcd3   :  { %v2457_v20 = vmul.f32 0.01, %v2383_v16  ;;  %4338 = vmatprep.mubr.msk.f32.mxu0 %vm582_vm3, %v2470_v19  ;;  %vm2441_vm7 = vcmp.ge.f32.partialorder %v2383_v16, 0.0 }
 0xcd4   :  { %vm2440_vm8 = vcmp.ge.f32.partialorder %v2378_v18, 0.0  ;;  %v2456_v26 = vmul.f32 0.01, %v2378_v18  ;;  %v4306_v22 = vpop.f32.mrb[58].mxu1  ;;  %4339 = vmatmul.mubr.msk.f32.gmra.mrb[68].mxu0 %vm582_vm3, %v2471_v21 }
 0xcd5   :  { %v2393_v23 = vadd.f32 %v4306_v22, %v5453_v43  ;;  %v2387_v24 = vpop.f32.mrb[59].mxu1  ;;  %v2473_v62 = vsel %vm2441_vm7, %v2383_v16, %v2457_v20 }
 0xcd6   :  { %v2388_v25 = vadd.f32 %v2387_v24, %v5453_v43  ;;  %v2472_v51 = vsel %vm2440_vm8, %v2378_v18, %v2456_v26 }
 0xcd7   :  { %v2459_v57 = vmul.f32 0.01, %v2393_v23  ;;  %4341 = vmatprep.mubr.msk.f32.mxu0 %vm582_vm3, %v2472_v51  ;;  %vm2443_vm9 = vcmp.ge.f32.partialorder %v2393_v23, 0.0 }
 0xcd8   :  { %vm2442_vm11 = vcmp.ge.f32.partialorder %v2388_v25, 0.0  ;;  %v2458_v27 = vmul.f32 0.01, %v2388_v25  ;;  %v4309_v28 = vpop.f32.mrb[60].mxu1  ;;  %4342 = vmatmul.mubr.msk.f32.gmra.mrb[70].mxu0 %vm582_vm3, %v2473_v62 }
 0xcd9   :  { %v2403_v31 = vadd.f32 %v4309_v28, %v5453_v43  ;;  %v2397_v35 = vpop.f32.mrb[61].mxu1  ;;  %v2475_v34 = vsel %vm2443_vm9, %v2393_v23, %v2459_v57  ;;  %v1820_v28 = vld [vmem:[%s5695_s2 + $0x210] sm:$0xff] }
 0xcda   :  { %v2398_v4 = vadd.f32 %v2397_v35, %v5453_v43  ;;  %v2474_v3 = vsel %vm2442_vm11, %v2388_v25, %v2458_v27  ;;  %v1812_v35 = vld [vmem:[%s5695_s2 + $0x270] sm:$0xff] }
 0xcdb   :  { %v2461_v45 = vmul.f32 0.01, %v2403_v31  ;;  %4344 = vmatprep.mubr.msk.f32.mxu0 %vm582_vm3, %v2474_v3  ;;  %vm2445_vm12 = vcmp.ge.f32.partialorder %v2403_v31, 0.0 }
 0xcdc   :  { %vm2444_vm13 = vcmp.ge.f32.partialorder %v2398_v4, 0.0  ;;  %v2460_v2 = vmul.f32 0.01, %v2398_v4  ;;  %v4312_v5 = vpop.f32.mrb[62].mxu1  ;;  %4345 = vmatmul.mubr.msk.f32.gmra.mrb[72].mxu0 %vm582_vm3, %v2475_v34 }
 0xcdd   :  { %v2413_v6 = vadd.f32 %v4312_v5, %v5453_v43  ;;  %v2407_v7 = vpop.f32.mrb[63].mxu1  ;;  %v2477_v11 = vsel %vm2445_vm12, %v2403_v31, %v2461_v45 }
 0xcde   :  { %v2408_v8 = vadd.f32 %v2407_v7, %v5453_v43  ;;  %v2476_v9 = vsel %vm2444_vm13, %v2398_v4, %v2460_v2  ;;  %v5499_v4 = vrot.slane %v1812_v35, %v4898_v46 }
 0xcdf   :  { %v2463_v10 = vmul.f32 0.01, %v2413_v6  ;;  %4347 = vmatprep.mubr.msk.f32.mxu0 %vm582_vm3, %v2476_v9  ;;  %vm2447_vm14 = vcmp.ge.f32.partialorder %v2413_v6, 0.0 }
 0xce0   :  { %vm2446_vm15 = vcmp.ge.f32.partialorder %v2408_v8, 0.0  ;;  %v2462_v12 = vmul.f32 0.01, %v2408_v8  ;;  %v4315_v13 = vpop.f32.mrb[64].mxu1  ;;  %4348 = vmatmul.mubr.msk.f32.gmra.mrb[74].mxu0 %vm582_vm3, %v2477_v11 }
 0xce1   :  { %v2423_v14 = vadd.f32 %v4315_v13, %v5453_v43  ;;  %v2417_v15 = vpop.f32.mrb[65].mxu1  ;;  %v2479_v19 = vsel %vm2447_vm14, %v2413_v6, %v2463_v10 }
 0xce2   :  { %v2418_v16 = vadd.f32 %v2417_v15, %v5453_v43  ;;  %v2478_v17 = vsel %vm2446_vm15, %v2408_v8, %v2462_v12 }
 0xce3   :  { %v2465_v18 = vmul.f32 0.01, %v2423_v14  ;;  %4350 = vmatprep.mubr.msk.f32.mxu0 %vm582_vm3, %v2478_v17  ;;  %vm2449_vm1 = vcmp.ge.f32.partialorder %v2423_v14, 0.0 }
 0xce4   :  { %vm2448_vm2 = vcmp.ge.f32.partialorder %v2418_v16, 0.0  ;;  %v2464_v20 = vmul.f32 0.01, %v2418_v16  ;;  %v4318_v21 = vpop.f32.mrb[66].mxu1  ;;  %4351 = vmatmul.mubr.msk.f32.gmra.mrb[76].mxu0 %vm582_vm3, %v2479_v19 }
 0xce5   :  { %v2433_v26 = vadd.f32 %v4318_v21, %v5453_v43  ;;  %v2427_v22 = vpop.f32.mrb[67].mxu1  ;;  %v2481_v51 = vsel %vm2449_vm1, %v2423_v14, %v2465_v18 }
 0xce6   :  { %v2428_v23 = vadd.f32 %v2427_v22, %v5453_v43  ;;  %v2480_v24 = vsel %vm2448_vm2, %v2418_v16, %v2464_v20  ;;  %v1819_v43 = vld [vmem:[%s5695_s2 + $0x208] sm:$0xff] }
 0xce7   :  { %v2467_v25 = vmul.f32 0.01, %v2433_v26  ;;  %4353 = vmatprep.mubr.msk.f32.mxu0 %vm582_vm3, %v2480_v24  ;;  %vm2451_vm4 = vcmp.ge.f32.partialorder %v2433_v26, 0.0  ;;  %v4616_v31 = vpack.c.bf16 %v1820_v28, %v1819_v43 }
 0xce8   :  { %vm2450_vm5 = vcmp.ge.f32.partialorder %v2428_v23, 0.0  ;;  %v2466_v57 = vmul.f32 0.01, %v2428_v23  ;;  %4354 = vmatmul.mubr.msk.f32.gmra.mrb[78].mxu0 %vm582_vm3, %v2481_v51 }
 0xce9   :  { %v2483_v27 = vsel %vm2451_vm4, %v2433_v26, %v2467_v25  ;;  %4617 = vmatprep.subr.bf16.mxu1 %v4616_v31 }
 0xcea   :  { %v2482_v62 = vsel %vm2450_vm5, %v2428_v23, %v2466_v57  ;;  %4619 = vmatpush3.bf16.msra.mxu1 %v4616_v31 }
 0xceb   :  { %4356 = vmatprep.mubr.msk.f32.mxu0 %vm582_vm3, %v2482_v62 }
 0xcec   :  { %4357 = vmatmul.mubr.msk.f32.gmra.mrb[80].mxu0 %vm582_vm3, %v2483_v27 }
 0xced   :  { %4431 = vmatprep.mubr.f32.mxu0 %v3662_v53 }
 0xda3   :  { %v4337_v3 = vpop.f32.mrb[66].mxu0 }
 0xda4   :  { %v2608_v53 = vadd.f32 %v4337_v3, %v5499_v4  ;;  %v2602_v45 = vpop.f32.mrb[67].mxu0 }
 0xda5   :  { %v2603_v34 = vadd.f32 %v2602_v45, %v5499_v4 }
 0xda6   :  { %v2698_v2 = vmul.f32 0.01, %v2608_v53  ;;  %vm2682_vm6 = vcmp.ge.f32.partialorder %v2608_v53, 0.0 }
 0xda7   :  { %vm2681_vm7 = vcmp.ge.f32.partialorder %v2603_v34, 0.0  ;;  %v2697_v5 = vmul.f32 0.01, %v2603_v34  ;;  %v4340_v6 = vpop.f32.mrb[68].mxu0 }
 0xda8   :  { %v2618_v7 = vadd.f32 %v4340_v6, %v5499_v4  ;;  %v2612_v8 = vpop.f32.mrb[69].mxu0  ;;  %v2714_v11 = vsel %vm2682_vm6, %v2608_v53, %v2698_v2 }
 0xda9   :  { %v2613_v9 = vadd.f32 %v2612_v8, %v5499_v4  ;;  %v2713_v10 = vsel %vm2681_vm7, %v2603_v34, %v2697_v5 }
 0xdaa   :  { %v2700_v12 = vmul.f32 0.01, %v2618_v7  ;;  %4375 = vmatprep.mubr.msk.f32.mxu1 %vm582_vm3, %v2713_v10  ;;  %vm2684_vm8 = vcmp.ge.f32.partialorder %v2618_v7, 0.0 }
 0xdab   :  { %vm2683_vm9 = vcmp.ge.f32.partialorder %v2613_v9, 0.0  ;;  %v2699_v13 = vmul.f32 0.01, %v2613_v9  ;;  %v4343_v14 = vpop.f32.mrb[70].mxu0  ;;  %4376 = vmatmul.mubr.msk.f32.vlgmr.msra.gmra.mrb[68].mxu1 %vm582_vm3, %v2714_v11 }
 0xdac   :  { %v2628_v15 = vadd.f32 %v4343_v14, %v5499_v4  ;;  %v2622_v16 = vpop.f32.mrb[71].mxu0  ;;  %v2716_v20 = vsel %vm2684_vm8, %v2618_v7, %v2700_v12 }
 0xdad   :  { %v2623_v17 = vadd.f32 %v2622_v16, %v5499_v4  ;;  %v2715_v18 = vsel %vm2683_vm9, %v2613_v9, %v2699_v13 }
 0xdae   :  { %v2702_v19 = vmul.f32 0.01, %v2628_v15  ;;  %4378 = vmatprep.mubr.msk.f32.mxu1 %vm582_vm3, %v2715_v18  ;;  %vm2686_vm11 = vcmp.ge.f32.partialorder %v2628_v15, 0.0 }
 0xdaf   :  { %vm2685_vm12 = vcmp.ge.f32.partialorder %v2623_v17, 0.0  ;;  %v2701_v21 = vmul.f32 0.01, %v2623_v17  ;;  %v4346_v26 = vpop.f32.mrb[72].mxu0  ;;  %4379 = vmatmul.mubr.msk.f32.gmra.mrb[70].mxu1 %vm582_vm3, %v2716_v20 }
 0xdb0   :  { %v2638_v22 = vadd.f32 %v4346_v26, %v5499_v4  ;;  %v2632_v23 = vpop.f32.mrb[73].mxu0  ;;  %v2718_v57 = vsel %vm2686_vm11, %v2628_v15, %v2702_v19 }
 0xdb1   :  { %v2633_v24 = vadd.f32 %v2632_v23, %v5499_v4  ;;  %v2717_v25 = vsel %vm2685_vm12, %v2623_v17, %v2701_v21 }
 0xdb2   :  { %v2704_v51 = vmul.f32 0.01, %v2638_v22  ;;  %4381 = vmatprep.mubr.msk.f32.mxu1 %vm582_vm3, %v2717_v25  ;;  %vm2688_vm13 = vcmp.ge.f32.partialorder %v2638_v22, 0.0 }
 0xdb3   :  { %vm2687_vm14 = vcmp.ge.f32.partialorder %v2633_v24, 0.0  ;;  %v2703_v62 = vmul.f32 0.01, %v2633_v24  ;;  %v4349_v27 = vpop.f32.mrb[74].mxu0  ;;  %4382 = vmatmul.mubr.msk.f32.gmra.mrb[72].mxu1 %vm582_vm3, %v2718_v57 }
 0xdb4   :  { %v2648_v43 = vadd.f32 %v4349_v27, %v5499_v4  ;;  %v2642_v28 = vpop.f32.mrb[75].mxu0  ;;  %v2720_v53 = vsel %vm2688_vm13, %v2638_v22, %v2704_v51  ;;  %v1822_v27 = vld [vmem:[%s5695_s2 + $0x218] sm:$0xff] }
 0xdb5   :  { %v2643_v31 = vadd.f32 %v2642_v28, %v5499_v4  ;;  %v2719_v35 = vsel %vm2687_vm14, %v2633_v24, %v2703_v62 }
 0xdb6   :  { %v2706_v3 = vmul.f32 0.01, %v2648_v43  ;;  %4384 = vmatprep.mubr.msk.f32.mxu1 %vm582_vm3, %v2719_v35  ;;  %vm2690_vm15 = vcmp.ge.f32.partialorder %v2648_v43, 0.0 }
 0xdb7   :  { %vm2689_vm1 = vcmp.ge.f32.partialorder %v2643_v31, 0.0  ;;  %v2705_v45 = vmul.f32 0.01, %v2643_v31  ;;  %v4352_v34 = vpop.f32.mrb[76].mxu0  ;;  %4385 = vmatmul.mubr.msk.f32.gmra.mrb[74].mxu1 %vm582_vm3, %v2720_v53 }
 0xdb8   :  { %v2658_v2 = vadd.f32 %v4352_v34, %v5499_v4  ;;  %v2652_v5 = vpop.f32.mrb[77].mxu0  ;;  %v2722_v9 = vsel %vm2690_vm15, %v2648_v43, %v2706_v3  ;;  %v5545_v3 = vrot.slane %v1822_v27, %v4898_v46 }
 0xdb9   :  { %v2653_v6 = vadd.f32 %v2652_v5, %v5499_v4  ;;  %v2721_v7 = vsel %vm2689_vm1, %v2643_v31, %v2705_v45 }
 0xdba   :  { %v2708_v8 = vmul.f32 0.01, %v2658_v2  ;;  %4387 = vmatprep.mubr.msk.f32.mxu1 %vm582_vm3, %v2721_v7  ;;  %vm2692_vm2 = vcmp.ge.f32.partialorder %v2658_v2, 0.0 }
 0xdbb   :  { %vm2691_vm4 = vcmp.ge.f32.partialorder %v2653_v6, 0.0  ;;  %v2707_v10 = vmul.f32 0.01, %v2653_v6  ;;  %v4355_v11 = vpop.f32.mrb[78].mxu0  ;;  %4388 = vmatmul.mubr.msk.f32.gmra.mrb[76].mxu1 %vm582_vm3, %v2722_v9 }
 0xdbc   :  { %v2668_v12 = vadd.f32 %v4355_v11, %v5499_v4  ;;  %v2662_v13 = vpop.f32.mrb[79].mxu0  ;;  %v2724_v17 = vsel %vm2692_vm2, %v2658_v2, %v2708_v8 }
 0xdbd   :  { %v2663_v14 = vadd.f32 %v2662_v13, %v5499_v4  ;;  %v2723_v15 = vsel %vm2691_vm4, %v2653_v6, %v2707_v10 }
 0xdbe   :  { %v2710_v16 = vmul.f32 0.01, %v2668_v12  ;;  %4390 = vmatprep.mubr.msk.f32.mxu1 %vm582_vm3, %v2723_v15  ;;  %vm2694_vm5 = vcmp.ge.f32.partialorder %v2668_v12, 0.0 }
 0xdbf   :  { %vm2693_vm6 = vcmp.ge.f32.partialorder %v2663_v14, 0.0  ;;  %v2709_v18 = vmul.f32 0.01, %v2663_v14  ;;  %v4358_v19 = vpop.f32.mrb[80].mxu0  ;;  %4391 = vmatmul.mubr.msk.f32.gmra.mrb[78].mxu1 %vm582_vm3, %v2724_v17 }
 0xdc0   :  { %v2678_v20 = vadd.f32 %v4358_v19, %v5499_v4  ;;  %v2672_v21 = vpop.f32.mrb[81].mxu0  ;;  %v2726_v24 = vsel %vm2694_vm5, %v2668_v12, %v2710_v16 }
 0xdc1   :  { %v2673_v26 = vadd.f32 %v2672_v21, %v5499_v4  ;;  %v2725_v22 = vsel %vm2693_vm6, %v2663_v14, %v2709_v18  ;;  %v1821_v4 = vld [vmem:[%s5695_s2 + $0x278] sm:$0xff] }
 0xdc2   :  { %v2712_v23 = vmul.f32 0.01, %v2678_v20  ;;  %4393 = vmatprep.mubr.msk.f32.mxu1 %vm582_vm3, %v2725_v22  ;;  %vm2696_vm7 = vcmp.ge.f32.partialorder %v2678_v20, 0.0  ;;  %v5537_v62 = vrot.slane %v1821_v4, %v4898_v46 }
 0xdc3   :  { %vm2695_vm8 = vcmp.ge.f32.partialorder %v2673_v26, 0.0  ;;  %v2711_v25 = vmul.f32 0.01, %v2673_v26  ;;  %4394 = vmatmul.mubr.msk.f32.gmra.mrb[80].mxu1 %vm582_vm3, %v2726_v24 }
 0xdc4   :  { %v2728_v57 = vsel %vm2696_vm7, %v2678_v20, %v2712_v23 }
 0xdc5   :  { %v2727_v51 = vsel %vm2695_vm8, %v2673_v26, %v2711_v25 }
 0xdc6   :  { %4396 = vmatprep.mubr.msk.f32.mxu1 %vm582_vm3, %v2727_v51 }
 0xdc7   :  { %4397 = vmatmul.mubr.msk.f32.gmra.mrb[82].mxu1 %vm582_vm3, %v2728_v57 }
 0xe7e   :  { %v4377_v43 = vpop.f32.mrb[68].mxu1 }
 0xe7f   :  { %v2853_v28 = vadd.f32 %v4377_v43, %v5537_v62  ;;  %v2847_v31 = vpop.f32.mrb[69].mxu1 }
 0xe80   :  { %v2848_v35 = vadd.f32 %v2847_v31, %v5537_v62 }
 0xe81   :  { %vm2927_vm9 = vcmp.ge.f32.partialorder %v2853_v28, 0.0  ;;  %v2943_v53 = vmul.f32 0.01, %v2853_v28 }
 0xe82   :  { %vm2926_vm11 = vcmp.ge.f32.partialorder %v2848_v35, 0.0  ;;  %v2942_v45 = vmul.f32 0.01, %v2848_v35  ;;  %v4380_v34 = vpop.f32.mrb[70].mxu1 }
 0xe83   :  { %v2863_v2 = vadd.f32 %v4380_v34, %v5537_v62  ;;  %v2857_v5 = vpop.f32.mrb[71].mxu1  ;;  %v2959_v6 = vsel %vm2927_vm9, %v2853_v28, %v2943_v53 }
 0xe84   :  { %v2858_v7 = vadd.f32 %v2857_v5, %v5537_v62  ;;  %v2979_v8 = vmul.f32 %v5545_v3, %v2959_v6  ;;  %v2958_v9 = vsel %vm2926_vm11, %v2848_v35, %v2942_v45 }
 0xe85   :  { %vm2929_vm12 = vcmp.ge.f32.partialorder %v2863_v2, 0.0  ;;  %v2945_v10 = vmul.f32 0.01, %v2863_v2  ;;  %v2978_v11 = vmul.f32 %v5545_v3, %v2958_v9 }
 0xe86   :  { %vm2928_vm13 = vcmp.ge.f32.partialorder %v2858_v7, 0.0  ;;  %v2944_v12 = vmul.f32 0.01, %v2858_v7  ;;  %v4383_v13 = vpop.f32.mrb[72].mxu1  ;;  %v2997_v14 = vsel %vm1334_vm10, %v2979_v8, 0.0 }
 0xe87   :  { %v2873_v15 = vadd.f32 %v4383_v13, %v5537_v62  ;;  %2998 = vadd.xlane.f32.xlu0 %v2997_v14  ;;  %v2867_v16 = vpop.f32.mrb[73].mxu1  ;;  %v2994_v17 = vsel %vm1334_vm10, %v2978_v11, 0.0  ;;  %v2961_v18 = vsel %vm2929_vm12, %v2863_v2, %v2945_v10 }
 0xe88   :  { %v2868_v19 = vadd.f32 %v2867_v16, %v5537_v62  ;;  %2995 = vadd.xlane.f32.xlu1 %v2994_v17  ;;  %v2960_v20 = vsel %vm2928_vm13, %v2858_v7, %v2944_v12  ;;  %v2981_v21 = vmul.f32 %v5545_v3, %v2961_v18  ;;  %vm3451_vm13 = vcmask 293888  }
 0xe89   :  { %vm2931_vm14 = vcmp.ge.f32.partialorder %v2873_v15, 0.0  ;;  %v2947_v26 = vmul.f32 0.01, %v2873_v15  ;;  %v2980_v22 = vmul.f32 %v5545_v3, %v2960_v20 }
 0xe8a   :  { %vm2930_vm15 = vcmp.ge.f32.partialorder %v2868_v19, 0.0  ;;  %v2946_v23 = vmul.f32 0.01, %v2868_v19  ;;  %v4386_v24 = vpop.f32.mrb[74].mxu1  ;;  %v3003_v25 = vsel %vm1334_vm10, %v2981_v21, 0.0 }
 0xe8b   :  { %v2883_v51 = vadd.f32 %v4386_v24, %v5537_v62  ;;  %v2877_v57 = vpop.f32.mrb[75].mxu1  ;;  %v3000_v4 = vsel %vm1334_vm10, %v2980_v22, 0.0  ;;  %v2963_v27 = vsel %vm2931_vm14, %v2873_v15, %v2947_v26 }
 0xe8c   :  { %v2878_v43 = vadd.f32 %v2877_v57, %v5537_v62  ;;  %3001 = vadd.xlane.f32.xlu0 %v3000_v4  ;;  %3004 = vadd.xlane.f32.xlu1 %v3003_v25  ;;  %v2962_v28 = vsel %vm2930_vm15, %v2868_v19, %v2946_v23  ;;  %v2983_v31 = vmul.f32 %v5545_v3, %v2963_v27 }
 0xe8d   :  { %vm2933_vm1 = vcmp.ge.f32.partialorder %v2883_v51, 0.0  ;;  %v2949_v35 = vmul.f32 0.01, %v2883_v51  ;;  %v2982_v53 = vmul.f32 %v5545_v3, %v2962_v28 }
 0xe8e   :  { %vm2932_vm2 = vcmp.ge.f32.partialorder %v2878_v43, 0.0  ;;  %v2948_v45 = vmul.f32 0.01, %v2878_v43  ;;  %v4389_v34 = vpop.f32.mrb[76].mxu1  ;;  %v3009_v2 = vsel %vm1334_vm10, %v2983_v31, 0.0 }
 0xe8f   :  { %v2893_v5 = vadd.f32 %v4389_v34, %v5537_v62  ;;  %v2887_v6 = vpop.f32.mrb[77].mxu1  ;;  %v3006_v7 = vsel %vm1334_vm10, %v2982_v53, 0.0  ;;  %v2965_v8 = vsel %vm2933_vm1, %v2883_v51, %v2949_v35 }
 0xe90   :  { %v2888_v9 = vadd.f32 %v2887_v6, %v5537_v62  ;;  %3007 = vadd.xlane.f32.xlu0 %v3006_v7  ;;  %3010 = vadd.xlane.f32.xlu1 %v3009_v2  ;;  %v2964_v10 = vsel %vm2932_vm2, %v2878_v43, %v2948_v45  ;;  %v2985_v11 = vmul.f32 %v5545_v3, %v2965_v8 }
 0xe91   :  { %vm2935_vm4 = vcmp.ge.f32.partialorder %v2893_v5, 0.0  ;;  %v2951_v12 = vmul.f32 0.01, %v2893_v5  ;;  %v2984_v13 = vmul.f32 %v5545_v3, %v2964_v10 }
 0xe92   :  { %vm2934_vm5 = vcmp.ge.f32.partialorder %v2888_v9, 0.0  ;;  %v2950_v14 = vmul.f32 0.01, %v2888_v9  ;;  %v4392_v15 = vpop.f32.mrb[78].mxu1  ;;  %v3015_v16 = vsel %vm1334_vm10, %v2985_v11, 0.0 }
 0xe93   :  { %v2903_v17 = vadd.f32 %v4392_v15, %v5537_v62  ;;  %v2897_v18 = vpop.f32.mrb[79].mxu1  ;;  %v3012_v19 = vsel %vm1334_vm10, %v2984_v13, 0.0  ;;  %v2967_v20 = vsel %vm2935_vm4, %v2893_v5, %v2951_v12 }
 0xe94   :  { %v2898_v21 = vadd.f32 %v2897_v18, %v5537_v62  ;;  %3013 = vadd.xlane.f32.xlu0 %v3012_v19  ;;  %3016 = vadd.xlane.f32.xlu1 %v3015_v16  ;;  %v2966_v26 = vsel %vm2934_vm5, %v2888_v9, %v2950_v14  ;;  %v2987_v22 = vmul.f32 %v5545_v3, %v2967_v20 }
 0xe95   :  { %vm2937_vm6 = vcmp.ge.f32.partialorder %v2903_v17, 0.0  ;;  %v2953_v23 = vmul.f32 0.01, %v2903_v17  ;;  %v2986_v24 = vmul.f32 %v5545_v3, %v2966_v26 }
 0xe96   :  { %vm2936_vm7 = vcmp.ge.f32.partialorder %v2898_v21, 0.0  ;;  %v2952_v25 = vmul.f32 0.01, %v2898_v21  ;;  %v4395_v51 = vpop.f32.mrb[80].mxu1  ;;  %v3021_v57 = vsel %vm1334_vm10, %v2987_v22, 0.0 }
 0xe97   :  { %v2913_v4 = vadd.f32 %v4395_v51, %v5537_v62  ;;  %v2907_v27 = vpop.f32.mrb[81].mxu1  ;;  %v3018_v43 = vsel %vm1334_vm10, %v2986_v24, 0.0  ;;  %v2969_v28 = vsel %vm2937_vm6, %v2903_v17, %v2953_v23  ;;  %v1823_v23 = vld [vmem:[%s5695_s2 + $0x280] sm:$0xff] }
 0xe98   :  { %v2908_v31 = vadd.f32 %v2907_v27, %v5537_v62  ;;  %3019 = vadd.xlane.f32.xlu0 %v3018_v43  ;;  %3022 = vadd.xlane.f32.xlu1 %v3021_v57  ;;  %v2968_v35 = vsel %vm2936_vm7, %v2898_v21, %v2952_v25  ;;  %v2989_v53 = vmul.f32 %v5545_v3, %v2969_v28 }
 0xe99   :  { %vm2939_vm8 = vcmp.ge.f32.partialorder %v2913_v4, 0.0  ;;  %v2955_v45 = vmul.f32 0.01, %v2913_v4  ;;  %v2988_v34 = vmul.f32 %v5545_v3, %v2968_v35  ;;  %v3045_v24 = vrot.slane %v1823_v23, %v4898_v46 }
 0xe9a   :  { %vm2938_vm9 = vcmp.ge.f32.partialorder %v2908_v31, 0.0  ;;  %v2954_v2 = vmul.f32 0.01, %v2908_v31  ;;  %v4398_v5 = vpop.f32.mrb[82].mxu1  ;;  %v3027_v6 = vsel %vm1334_vm10, %v2989_v53, 0.0 }
 0xe9b   :  { %v2923_v7 = vadd.f32 %v4398_v5, %v5537_v62  ;;  %v2917_v8 = vpop.f32.mrb[83].mxu1  ;;  %v3024_v9 = vsel %vm1334_vm10, %v2988_v34, 0.0  ;;  %v2971_v10 = vsel %vm2939_vm8, %v2913_v4, %v2955_v45 }
 0xe9c   :  { %v2918_v11 = vadd.f32 %v2917_v8, %v5537_v62  ;;  %3025 = vadd.xlane.f32.xlu0 %v3024_v9  ;;  %3028 = vadd.xlane.f32.xlu1 %v3027_v6  ;;  %v2970_v12 = vsel %vm2938_vm9, %v2908_v31, %v2954_v2  ;;  %v2991_v13 = vmul.f32 %v5545_v3, %v2971_v10 }
 0xe9d   :  { %vm2941_vm11 = vcmp.ge.f32.partialorder %v2923_v7, 0.0  ;;  %v2957_v14 = vmul.f32 0.01, %v2923_v7  ;;  %v2990_v15 = vmul.f32 %v5545_v3, %v2970_v12 }
 0xe9e   :  { %vm2940_vm12 = vcmp.ge.f32.partialorder %v2918_v11, 0.0  ;;  %v2956_v16 = vmul.f32 0.01, %v2918_v11  ;;  %v3033_v17 = vsel %vm1334_vm10, %v2991_v13, 0.0 }
 0xe9f   :  { %v3030_v18 = vsel %vm1334_vm10, %v2990_v15, 0.0  ;;  %v2973_v19 = vsel %vm2941_vm11, %v2923_v7, %v2957_v14 }
 0xea0   :  { %3031 = vadd.xlane.f32.xlu0 %v3030_v18  ;;  %3034 = vadd.xlane.f32.xlu1 %v3033_v17  ;;  %v2993_v62 = vmul.f32 %v5545_v3, %v2973_v19  ;;  %v2972_v20 = vsel %vm2940_vm12, %v2918_v11, %v2956_v16 }
 0xea1   :  { %v2992_v21 = vmul.f32 %v5545_v3, %v2972_v20 }
 0xea2   :  { %v3039_v26 = vsel %vm1334_vm10, %v2993_v62, 0.0 }
 0xea3   :  { %v3036_v22 = vsel %vm1334_vm10, %v2992_v21, 0.0 }
 0xea4   :  { %3040 = vadd.xlane.f32.xlu1 %v3039_v26  ;;  %3037 = vadd.xlane.f32.xlu0 %v3036_v22 }
 0xf14   :  { %v2999_v25 = vpop.xlane.xlu0 %2998 }
 0xf15   :  { %v3047_v51 = vadd.f32 %v3045_v24, %v2999_v25  ;;  %v2996_v57 = vpop.xlane.xlu1 %2995 }
 0xf16   :  { %v3046_v4 = vadd.f32 %v3045_v24, %v2996_v57 }
 0xf17   :  { %3069 = vperm.xlu1 %4676, %v3047_v51  }
 0xf18   :  { %3064 = vperm.xlu0 %4675, %v3046_v4  }
 0xf19   :  { %v3002_v27 = vpop.xlane.xlu0 %3001  ;;  %v3005_v3 = vpop.xlane.xlu1 %3004 }
 0xf1a   :  { %v3048_v43 = vadd.f32 %v3045_v24, %v3002_v27  ;;  %v3049_v28 = vadd.f32 %v3045_v24, %v3005_v3 }
 0xf1c   :  { %3074 = vperm.xlu1 %4676, %v3048_v43   ;;  %3079 = vperm.xlu0 %4675, %v3049_v28  }
 0xf1d   :  { %v3008_v31 = vpop.xlane.xlu0 %3007  ;;  %v3011_v35 = vpop.xlane.xlu1 %3010 }
 0xf1e   :  { %v3050_v53 = vadd.f32 %v3045_v24, %v3008_v31  ;;  %v3051_v45 = vadd.f32 %v3045_v24, %v3011_v35 }
 0xf20   :  { %3084 = vperm.xlu1 %4676, %v3050_v53   ;;  %3089 = vperm.xlu0 %4675, %v3051_v45  }
 0xf21   :  { %v3014_v34 = vpop.xlane.xlu0 %3013  ;;  %v3017_v2 = vpop.xlane.xlu1 %3016 }
 0xf22   :  { %v3052_v5 = vadd.f32 %v3045_v24, %v3014_v34  ;;  %v3053_v6 = vadd.f32 %v3045_v24, %v3017_v2 }
 0xf24   :  { %3094 = vperm.xlu1 %4676, %v3052_v5   ;;  %3099 = vperm.xlu0 %4675, %v3053_v6  }
 0xf25   :  { %v3020_v7 = vpop.xlane.xlu0 %3019  ;;  %v3023_v8 = vpop.xlane.xlu1 %3022 }
 0xf26   :  { %v3054_v9 = vadd.f32 %v3045_v24, %v3020_v7  ;;  %v3055_v10 = vadd.f32 %v3045_v24, %v3023_v8 }
 0xf28   :  { %3104 = vperm.xlu1 %4676, %v3054_v9   ;;  %3109 = vperm.xlu0 %4675, %v3055_v10  }
 0xf29   :  { %v3026_v11 = vpop.xlane.xlu0 %3025  ;;  %v3029_v12 = vpop.xlane.xlu1 %3028 }
 0xf2a   :  { %v3056_v13 = vadd.f32 %v3045_v24, %v3026_v11  ;;  %v3057_v14 = vadd.f32 %v3045_v24, %v3029_v12  ;;  %v4695_v12 = vld [vmem:[%s5695_s2 + $0x8] sm:$0xff] }
 0xf2c   :  { %3114 = vperm.xlu1 %4676, %v3056_v13   ;;  %3119 = vperm.xlu0 %4675, %v3057_v14   ;;  %v4696_v14 = vld [vmem:[%s5695_s2] sm:$0xff] }
 0xf2d   :  { %v3032_v15 = vpop.xlane.xlu0 %3031  ;;  %v3035_v16 = vpop.xlane.xlu1 %3034 }
 0xf2e   :  { %v3058_v17 = vadd.f32 %v3045_v24, %v3032_v15  ;;  %v3059_v18 = vadd.f32 %v3045_v24, %v3035_v16 }
 0xf30   :  { %3124 = vperm.xlu1 %4676, %v3058_v17   ;;  %3129 = vperm.xlu0 %4675, %v3059_v18  }
 0xf31   :  { %v3041_v19 = vpop.xlane.xlu1 %3040  ;;  %v3038_v62 = vpop.xlane.xlu0 %3037 }
 0xf32   :  { %v3061_v20 = vadd.f32 %v3045_v24, %v3041_v19  ;;  %v3060_v21 = vadd.f32 %v3045_v24, %v3038_v62 }
 0xf34   :  { %3139 = vperm.xlu0 %4675, %v3061_v20   ;;  %3134 = vperm.xlu1 %4676, %v3060_v21  }
 0xf96   :  { %v3070_v26 = vpop.permute.xlu1 %3069 }
 0xf97   :  { %v3143_v22 = vmul.f32 %v3667_v56, %v3070_v26  ;;  %v3065_v23 = vpop.permute.xlu0 %3064 }
 0xf98   :  { %v3142_v25 = vmul.f32 %v3666_v55, %v3065_v23 }
 0xf9a   :  { %v4620_v51 = vpack.c.bf16 %v3143_v22, %v3142_v25 }
 0xf9b   :  { %v3075_v57 = vpop.permute.xlu1 %3074  ;;  %v3080_v4 = vpop.permute.xlu0 %3079 }
 0xf9c   :  { %v3144_v27 = vmul.f32 %v3670_v0, %v3075_v57  ;;  %v3145_v3 = vmul.f32 %v3671_v48, %v3080_v4  ;;  %4621 = vmatprep.subr.bf16.mxu0 %v4620_v51 }
 0xf9d   :  { %4623 = vmatpush3.bf16.msra.mxu0 %v4620_v51 }
 0xf9e   :  { %v4624_v24 = vpack.c.bf16 %v3145_v3, %v3144_v27 }
 0xf9f   :  { %v3085_v43 = vpop.permute.xlu1 %3084  ;;  %v3090_v28 = vpop.permute.xlu0 %3089 }
 0xfa0   :  { %v3146_v56 = vmul.f32 %v3674_v33, %v3085_v43  ;;  %v3147_v54 = vmul.f32 %v3675_v32, %v3090_v28  ;;  %4625 = vmatprep.subr.bf16.mxu0 %v4624_v24  ;;  %v1825_v43 = vld [vmem:[%s5695_s2 + $0x228] sm:$0xff]  ;;  %v1826_v28 = vld [vmem:[%s5695_s2 + $0x230] sm:$0xff] }
 0xfa1   :  { %4627 = vmatpush3.bf16.msra.mxu0 %v4624_v24  ;;  %v1824_v24 = vld [vmem:[%s5695_s2 + $0x220] sm:$0xff] }
 0xfa2   :  { %v4628_v55 = vpack.c.bf16 %v3147_v54, %v3146_v56  ;;  %v4656_v56 = vpack.c.bf16 %v1825_v43, %v1824_v24  ;;  %v1827_v54 = vld [vmem:[%s5695_s2 + $0x238] sm:$0xff] }
 0xfa3   :  { %v3095_v31 = vpop.permute.xlu1 %3094  ;;  %v3100_v35 = vpop.permute.xlu0 %3099 }
 0xfa4   :  { %v3148_v61 = vmul.f32 %v3678_v41, %v3095_v31  ;;  %v3149_v48 = vmul.f32 %v3679_v39, %v3100_v35  ;;  %4629 = vmatprep.subr.bf16.mxu0 %v4628_v55  ;;  %v1828_v31 = vld [vmem:[%s5695_s2 + $0x240] sm:$0xff]  ;;  %v1829_v35 = vld [vmem:[%s5695_s2 + $0x248] sm:$0xff]  ;;  %4657 = vmatprep.subr.bf16.mxu1 %v4656_v56 }
 0xfa5   :  { %4631 = vmatpush3.bf16.msra.mxu0 %v4628_v55  ;;  %v4660_v55 = vpack.c.bf16 %v1827_v54, %v1826_v28  ;;  %4659 = vmatpush3.bf16.msra.mxu1 %v4656_v56 }
 0xfa6   :  { %v4632_v0 = vpack.c.bf16 %v3149_v48, %v3148_v61  ;;  %v4664_v61 = vpack.c.bf16 %v1829_v35, %v1828_v31  ;;  %v1830_v48 = vld [vmem:[%s5695_s2 + $0x250] sm:$0xff] }
 0xfa7   :  { %v3105_v53 = vpop.permute.xlu1 %3104  ;;  %v3110_v45 = vpop.permute.xlu0 %3109  ;;  %4661 = vmatprep.subr.bf16.mxu1 %v4660_v55 }
 0xfa8   :  { %v3150_v29 = vmul.f32 %v3682_v49, %v3105_v53  ;;  %v3151_v32 = vmul.f32 %v3683_v44, %v3110_v45  ;;  %4633 = vmatprep.subr.bf16.mxu0 %v4632_v0  ;;  %v5701_v44 = vunpack.c.h.bf16 %v5183_v1  ;;  %v5704_v1 = vunpack.c.h.bf16 %v5113_v40 }
 0xfa9   :  { %4635 = vmatpush3.bf16.msra.mxu0 %v4632_v0  ;;  %v1831_v0 = vld [vmem:[%s5695_s2 + $0x258] sm:$0xff]  ;;  %4663 = vmatpush3.bf16.msra.mxu1 %v4660_v55 }
 0xfaa   :  { %v4636_v33 = vpack.c.bf16 %v3151_v32, %v3150_v29  ;;  %4665 = vmatprep.subr.bf16.mxu1 %v4664_v61  ;;  %v4668_v53 = vpack.c.bf16 %v1831_v0, %v1830_v48 }
 0xfab   :  { %v3115_v34 = vpop.permute.xlu1 %3114  ;;  %v3120_v2 = vpop.permute.xlu0 %3119 }
 0xfac   :  { %v3152_v37 = vmul.f32 %v3686_v63, %v3115_v34  ;;  %v3153_v39 = vmul.f32 %v3687_v60, %v3120_v2  ;;  %4637 = vmatprep.subr.bf16.mxu0 %v4636_v33  ;;  %v5702_v63 = vunpack.c.l.bf16 %v5194_v38  ;;  %v5703_v60 = vunpack.c.h.bf16 %v5194_v38 }
 0xfad   :  { %4639 = vmatpush3.bf16.msra.mxu0 %v4636_v33  ;;  %4667 = vmatpush3.bf16.msra.mxu1 %v4664_v61 }
 0xfae   :  { %v4640_v41 = vpack.c.bf16 %v3153_v39, %v3152_v37  ;;  %4669 = vmatprep.subr.bf16.mxu1 %v4668_v53  ;;  %v1832_v37 = vld [vmem:[%s5695_s2 + $0x288] sm:$0xff] }
 0xfaf   :  { %v3125_v5 = vpop.permute.xlu1 %3124  ;;  %v3130_v6 = vpop.permute.xlu0 %3129  ;;  %v3351_v39 = vrot.slane %v1832_v37, %v4898_v46 }
 0xfb0   :  { %v3154_v42 = vmul.f32 %v3690_v36, %v3125_v5  ;;  %v3155_v49 = vmul.f32 %v5701_v44, %v3130_v6  ;;  %4641 = vmatprep.subr.bf16.mxu0 %v4640_v41 }
 0xfb1   :  { %4643 = vmatpush3.bf16.msra.mxu0 %v4640_v41  ;;  %4671 = vmatpush3.bf16.msra.mxu1 %v4668_v53 }
 0xfb2   :  { %v4644_v7 = vpack.c.bf16 %v3155_v49, %v3154_v42 }
 0xfb3   :  { %v3135_v8 = vpop.permute.xlu1 %3134  ;;  %v3140_v9 = vpop.permute.xlu0 %3139 }
 0xfb4   :  { %v3156_v50 = vmul.f32 %v5702_v63, %v3135_v8  ;;  %v3157_v10 = vmul.f32 %v5703_v60, %v3140_v9  ;;  %4645 = vmatprep.subr.bf16.mxu0 %v4644_v7 }
 0xfb5   :  { %4647 = vmatpush3.bf16.msra.mxu0 %v4644_v7 }
 0xfb6   :  { %v4648_v11 = vpack.c.bf16 %v3157_v10, %v3156_v50 }
 0xfb8   :  { %4649 = vmatprep.subr.bf16.mxu0 %v4648_v11 }
 0xfb9   :  { %4651 = vmatpush3.bf16.msra.mxu0 %v4648_v11 }
 0xfba   :  { %4653 = vmatprep.subr.bf16.mxu0 %v5274_v59 }
 0xfbc   :  { %4432 = vmatmul.mubr.f32.vlgmr.msra.gmra.mrb[82].mxu0 %v5704_v1 }
 0xfbd   :  { %4655 = vmatpush3.bf16.msra.mxu0 %v5274_v59 }
0x108f   :  { %v4433_v36 = vpop.f32.mrb[82].mxu0 }
0x1090   :  { %v3234_v13 = vsub.f32 %v4433_v36, %v4695_v12  ;;  %v3224_v38 = vpop.f32.mrb[83].mxu0 }
0x1091   :  { %v3233_v15 = vsub.f32 %v3224_v38, %v4696_v14 }
0x1092   :  { %v3238_v16 = vsel %vm123_vm0, %v3234_v13, -inf }
0x1093   :  { %3239 = vmax.xlane.f32.xlu0 %v3238_v16  ;;  %v3235_v40 = vsel %vm123_vm0, %v3233_v15, -inf }
0x1094   :  { %3236 = vmax.xlane.f32.xlu1 %v3235_v40 }
0x1120   :  { %v3240_v17 = vpop.xlane.xlu0 %3239 }
0x1121   :  { %v3242_v59 = vsub.f32 %v3234_v13, %v3240_v17  ;;  %v3237_v18 = vpop.xlane.xlu1 %3236 }
0x1122   :  { %v3241_v19 = vsub.f32 %v3233_v15, %v3237_v18 }
0x1123   :  { %v3245_v62 = vmul.f32 1.442695, %v3242_v59 }
0x1124   :  { %v3243_v20 = vmul.f32 1.442695, %v3241_v19 }
0x1125   :  { %4685 = vpow2.f32 %v3245_v62 }
0x1126   :  { %4687 = vpow2.f32 %v3243_v20 }
0x112f   :  { %v4686_v21 = vpop.eup %4685 }
0x1130   :  { %v4688_v26 = vpop.eup %4687  ;;  %v3250_v22 = vsel %vm123_vm0, %v4686_v21, 0.0 }
0x1131   :  { %3251 = vadd.xlane.f32.xlu1 %v3250_v22  ;;  %v3247_v23 = vsel %vm123_vm0, %v4688_v26, 0.0 }
0x1132   :  { %3248 = vadd.xlane.f32.xlu0 %v3247_v23 }
0x11be   :  { %v3252_v25 = vpop.xlane.xlu1 %3251 }
0x11bf   :  { %4689 = vrcp.f32 %v3252_v25  ;;  %v3249_v51 = vpop.xlane.xlu0 %3248 }
0x11c0   :  { %4691 = vrcp.f32 %v3249_v51 }
0x11c9   :  { %v4690_v57 = vpop.eup %4689 }
0x11ca   :  { %v4692_v4 = vpop.eup %4691  ;;  %v3256_v3 = vmul.f32 %v4690_v57, %v4686_v21 }
0x11cb   :  { %v3254_v27 = vmul.f32 %v4692_v4, %v4688_v26 }
0x11cd   :  { %4438 = vmatprep.mubr.msk.f32.mxu0 %vm123_vm0, %v3254_v27 }
0x11ce   :  { %4439 = vmatmul.mubr.msk.f32.vlgmr.msra.gmra.mrb[84].mxu0 %vm123_vm0, %v3256_v3 }
0x12a1   :  { %v4440_v45 = vpop.f32.mrb[84].mxu0 }
0x12a2   :  { %3342 = vrot.lane.b32.xlu1 %v4440_v45, %s4699_s27  ;;  %v3329_v29 = vpop.f32.mrb[85].mxu0 }
0x12a3   :  { %3340 = vrot.lane.b32.xlu0 %v3329_v29, %s4699_s27 }
0x12a6   :  { %3433 = vrot.lane.b32.xlu1 %v3254_v27, %s4698_s17 }
0x12a7   :  { %3435 = vrot.lane.b32.xlu0 %v3256_v3, %s4698_s17 }
0x1314   :  { %v3343_v32 = vpop.permute.xlu1 %3342 }
0x1315   :  { %v3341_v33 = vpop.permute.xlu0 %3340  ;;  %v3347_v2 = vsel %vm1334_vm10, %v5267_v30, %v3343_v32 }
0x1316   :  { %v3346_v34 = vsel %vm1334_vm10, %v5270_v52, %v3341_v33 }
0x1317   :  { %4457 = vmatprep.mubr.msk.f32.mxu1 %vm582_vm3, %v3346_v34 }
0x1318   :  { %4458 = vmatmul.mubr.msk.f32.vlgmr.msra.gmra.mrb[84].mxu1 %vm582_vm3, %v3347_v2  ;;  %v3434_v44 = vpop.permute.xlu1 %3433 }
0x1319   :  { %v3436_v52 = vpop.permute.xlu0 %3435  ;;  %v3447_v7 = vsel %vm123_vm0, %v5219_v58, %v3434_v44 }
0x131a   :  { %v3448_v30 = vsel %vm123_vm0, %v5221_v47, %v3436_v52 }
0x13eb   :  { %v4459_v41 = vpop.f32.mrb[84].mxu1 }
0x13ec   :  { %v3430_v5 = vadd.f32 %v4459_v41, %v3351_v39  ;;  %v3424_v6 = vpop.f32.mrb[85].mxu1 }
0x13ed   :  { %v3425_v42 = vadd.f32 %v3424_v6, %v3351_v39 }
0x13ee   :  { %3443 = vrot.lane.b32.xlu0 %v3430_v5, %s4699_s27 }
0x13ef   :  { %3441 = vrot.lane.b32.xlu1 %v3425_v42, %s4699_s27 }
0x1460   :  { %v3444_v49 = vpop.permute.xlu0 %3443 }
0x1461   :  { %v3450_v8 = vsel %vm1334_vm10, %v3448_v30, %v3444_v49  ;;  %v3442_v9 = vpop.permute.xlu1 %3441 }
0x1462   :  { %v3453_v46 = vsel %vm3451_vm13, %v3450_v8, 0.0  ;;  %v3449_v63 = vsel %vm1334_vm10, %v3447_v7, %v3442_v9 }
0x1463   :  { %3455 = vst [vmem:[%s5696_s3 + $0x8] sm:$0xff] %v3453_v46  ;;  %v3452_v50 = vsel %vm3451_vm13, %v3449_v63, 0.0 }
0x1464   :  { %3454 = vst [vmem:[%s5696_s3] sm:$0xff] %v3452_v50 }

</bundles_post_ra>
